<compile_context>
chip_gen: v7x
topology: tpu7x:2x2x1
jax: 0.10.0
libtpu: 0.0.40
codegen_flags: <defaults>
</compile_context>

<pallas_src>
import jax
import jax.numpy as jnp
from jax.experimental import pallas as pl
from jax.experimental.pallas import tpu as pltpu


def _fused_generator_kernel(x_ref,
                            w1_hbm, w2_hbm, w3_hbm, w4_hbm,
                            b1_ref, b2_ref, b3_ref, b4_ref,
                            o_ref,
                            w1_v, w2_v, w3_v, w4_v, dma_sems):
    """Fused fc1..fc4 forward. Weights arrive via manual, overlapped DMA."""
    # Issue all weight DMAs immediately: later layers' transfers overlap with
    # earlier layers' matmuls (the kernel is weight-DMA bound, not compute).
    cp1 = pltpu.make_async_copy(w1_hbm, w1_v, dma_sems.at[0])
    cp2 = pltpu.make_async_copy(w2_hbm, w2_v, dma_sems.at[1])
    cp3 = pltpu.make_async_copy(w3_hbm, w3_v, dma_sems.at[2])
    cp4 = pltpu.make_async_copy(w4_hbm, w4_v, dma_sems.at[3])
    cp1.start()
    cp2.start()
    cp3.start()
    cp4.start()

    def layer(h, copy, w_vmem, b_ref, activation):
        copy.wait()  # only this layer's weights need to have landed
        acc = jnp.dot(h.astype(jnp.bfloat16), w_vmem[...],
                      preferred_element_type=jnp.float32)
        acc = acc + b_ref[...]                      # fp32 bias add
        if activation == "leaky_relu":
            return jnp.where(acc >= 0, acc, 0.2 * acc)   # fp32 epilogue (VPU)
        return jnp.tanh(acc)                             # fp32 epilogue (EUP)

    h = x_ref[...]                                   # (B, input_dim) fp32
    h = layer(h, cp1, w1_v, b1_ref, "leaky_relu")
    h = layer(h, cp2, w2_v, b2_ref, "leaky_relu")
    h = layer(h, cp3, w3_v, b3_ref, "leaky_relu")
    h = layer(h, cp4, w4_v, b4_ref, "tanh")
    o_ref[...] = h.astype(o_ref.dtype)


def generator_forward(params, x):
    """Single fused Pallas call implementing the whole Generator forward.

    params: list of 4 (w, b) pairs; w is (in, out) bfloat16, b is (out,) fp32.
    x:      (B, input_dim) fp32.
    """
    ws = [w for (w, _) in params]
    bs = [b.reshape(1, -1).astype(jnp.float32) for (_, b) in params]
    B, K = x.shape
    N_out = ws[-1].shape[1]

    weight_params = sum(int(w.shape[0]) * int(w.shape[1]) for w in ws)
    flops = 2 * B * weight_params
    transcendentals = B * N_out                      # final tanh
    bytes_accessed = (2 * weight_params              # bf16 weights
                      + 4 * (x.size + B * N_out)     # fp32 in/out activations
                      + 4 * sum(b.size for b in bs)) # fp32 biases

    vmem_spec_2d = lambda shape: pl.BlockSpec(shape, lambda i: (0, 0))
    hbm_spec = pl.BlockSpec(memory_space=pl.ANY)

    in_specs = ([vmem_spec_2d((B, K))]
                + [hbm_spec] * 4
                + [vmem_spec_2d(b.shape) for b in bs])

    scratch_shapes = ([pltpu.VMEM(w.shape, jnp.bfloat16) for w in ws]
                      + [pltpu.SemaphoreType.DMA((4,))])

    return pl.pallas_call(
        _fused_generator_kernel,
        out_shape=jax.ShapeDtypeStruct((B, N_out), jnp.float32),
        grid=(1,),
        in_specs=in_specs,
        out_specs=vmem_spec_2d((B, N_out)),
        scratch_shapes=scratch_shapes,
        compiler_params=pltpu.CompilerParams(
            dimension_semantics=("arbitrary",),
            vmem_limit_bytes=32 * 1024 * 1024,
        ),
        cost_estimate=pl.CostEstimate(
            flops=int(flops),
            transcendentals=int(transcendentals),
            bytes_accessed=int(bytes_accessed),
        ),
    )(x, *ws, *bs)


def init_generator_params(key, input_dim, output_dim):
    """Deterministic synthetic parameters matching the module's shapes.

    Weights are initialized in fp32 (PyTorch-style uniform) and stored as
    bfloat16, already transposed to (in, out). Biases stay fp32.
    """
    dims = [input_dim, 256, 512, 1024, output_dim]
    params = []
    for i in range(4):
        key, kw, kb = jax.random.split(key, 3)
        bound = 1.0 / jnp.sqrt(dims[i])
        w = jax.random.uniform(kw, (dims[i], dims[i + 1]),
                               jnp.float32, -bound, bound)
        b = jax.random.uniform(kb, (dims[i + 1],),
                               jnp.float32, -bound, bound)
        params.append((w.astype(jnp.bfloat16), b))
    return params


def ref_forward(params, x):
    """Pure-JAX reference with identical bf16 weight / fp32 accumulation math."""
    h = x
    for i, (w, b) in enumerate(params):
        h = jnp.dot(h.astype(jnp.bfloat16), w,
                    preferred_element_type=jnp.float32) + b
        h = jnp.where(h >= 0, h, 0.2 * h) if i < 3 else jnp.tanh(h)
    return h


if __name__ == "__main__":
    key = jax.random.PRNGKey(0)
    kx, kp = jax.random.split(key)

    batch = 8
    input_dim = 64      # latent noise dimension
    output_dim = 128    # generated sample dimension

    x = jax.random.normal(kx, (batch, input_dim), jnp.float32)
    params = init_generator_params(kp, input_dim, output_dim)

    fwd = jax.jit(generator_forward)
    out = jax.block_until_ready(fwd(params, x))

    ref_out = ref_forward(params, x)
    assert out.shape == (batch, output_dim)
    assert jnp.allclose(out, ref_out, atol=2e-3, rtol=2e-3), float(
        jnp.max(jnp.abs(out - ref_out)))

    print("KERNEL_OK")
</pallas_src>

<mosaic_0001>
module attributes {stable_mosaic.version = 11 : i64} {
  func.func @_fused_generator_kernel(%arg0: i32, %arg1: memref<8x64xf32, #tpu.memory_space<vmem>>, %arg2: memref<64x256xbf16, #tpu.memory_space<any>>, %arg3: memref<256x512xbf16, #tpu.memory_space<any>>, %arg4: memref<512x1024xbf16, #tpu.memory_space<any>>, %arg5: memref<1024x128xbf16, #tpu.memory_space<any>>, %arg6: memref<1x256xf32, #tpu.memory_space<vmem>>, %arg7: memref<1x512xf32, #tpu.memory_space<vmem>>, %arg8: memref<1x1024xf32, #tpu.memory_space<vmem>>, %arg9: memref<1x128xf32, #tpu.memory_space<vmem>>, %arg10: memref<8x128xf32, #tpu.memory_space<vmem>>, %arg11: memref<64x256xbf16, #tpu.memory_space<vmem>>, %arg12: memref<256x512xbf16, #tpu.memory_space<vmem>>, %arg13: memref<512x1024xbf16, #tpu.memory_space<vmem>>, %arg14: memref<1024x128xbf16, #tpu.memory_space<vmem>>, %arg15: memref<4x!tpu.dma_semaphore, #tpu.memory_space<semaphore_mem>>) attributes {dimension_semantics = [#tpu.dimension_semantics<arbitrary>], iteration_bounds = array<i64: 1>, scalar_prefetch = 0 : i64, scratch_operands = 5 : i64, tpu.core_type = #tpu.core_type<tc>, window_params = [{pipeline_mode = #tpu.pipeline_mode<synchronous>, transform_indices = @transform_0, window_bounds = array<i64: 8, 64>}, {}, {}, {}, {}, {pipeline_mode = #tpu.pipeline_mode<synchronous>, transform_indices = @transform_5, window_bounds = array<i64: 1, 256>}, {pipeline_mode = #tpu.pipeline_mode<synchronous>, transform_indices = @transform_6, window_bounds = array<i64: 1, 512>}, {pipeline_mode = #tpu.pipeline_mode<synchronous>, transform_indices = @transform_7, window_bounds = array<i64: 1, 1024>}, {pipeline_mode = #tpu.pipeline_mode<synchronous>, transform_indices = @transform_8, window_bounds = array<i64: 1, 128>}, {pipeline_mode = #tpu.pipeline_mode<synchronous>, transform_indices = @transform_9, window_bounds = array<i64: 8, 128>}]} {
    %c0_i32 = arith.constant 0 : i32
    %0 = tpu.memref_slice %arg15[%c0_i32] : memref<4x!tpu.dma_semaphore, #tpu.memory_space<semaphore_mem>> -> memref<1x!tpu.dma_semaphore, #tpu.memory_space<semaphore_mem>>
    %1 = tpu.memref_squeeze %0 : memref<1x!tpu.dma_semaphore, #tpu.memory_space<semaphore_mem>> -> memref<!tpu.dma_semaphore, #tpu.memory_space<semaphore_mem>>
    tpu.enqueue_dma source(%arg2 : memref<64x256xbf16, #tpu.memory_space<any>>) target(%arg11 : memref<64x256xbf16, #tpu.memory_space<vmem>>) target_semaphore(%1 : memref<!tpu.dma_semaphore, #tpu.memory_space<semaphore_mem>>)
    %c1_i32 = arith.constant 1 : i32
    %2 = tpu.memref_slice %arg15[%c1_i32] : memref<4x!tpu.dma_semaphore, #tpu.memory_space<semaphore_mem>> -> memref<1x!tpu.dma_semaphore, #tpu.memory_space<semaphore_mem>>
    %3 = tpu.memref_squeeze %2 : memref<1x!tpu.dma_semaphore, #tpu.memory_space<semaphore_mem>> -> memref<!tpu.dma_semaphore, #tpu.memory_space<semaphore_mem>>
    tpu.enqueue_dma source(%arg3 : memref<256x512xbf16, #tpu.memory_space<any>>) target(%arg12 : memref<256x512xbf16, #tpu.memory_space<vmem>>) target_semaphore(%3 : memref<!tpu.dma_semaphore, #tpu.memory_space<semaphore_mem>>)
    %c2_i32 = arith.constant 2 : i32
    %4 = tpu.memref_slice %arg15[%c2_i32] : memref<4x!tpu.dma_semaphore, #tpu.memory_space<semaphore_mem>> -> memref<1x!tpu.dma_semaphore, #tpu.memory_space<semaphore_mem>>
    %5 = tpu.memref_squeeze %4 : memref<1x!tpu.dma_semaphore, #tpu.memory_space<semaphore_mem>> -> memref<!tpu.dma_semaphore, #tpu.memory_space<semaphore_mem>>
    tpu.enqueue_dma source(%arg4 : memref<512x1024xbf16, #tpu.memory_space<any>>) target(%arg13 : memref<512x1024xbf16, #tpu.memory_space<vmem>>) target_semaphore(%5 : memref<!tpu.dma_semaphore, #tpu.memory_space<semaphore_mem>>)
    %c3_i32 = arith.constant 3 : i32
    %6 = tpu.memref_slice %arg15[%c3_i32] : memref<4x!tpu.dma_semaphore, #tpu.memory_space<semaphore_mem>> -> memref<1x!tpu.dma_semaphore, #tpu.memory_space<semaphore_mem>>
    %7 = tpu.memref_squeeze %6 : memref<1x!tpu.dma_semaphore, #tpu.memory_space<semaphore_mem>> -> memref<!tpu.dma_semaphore, #tpu.memory_space<semaphore_mem>>
    tpu.enqueue_dma source(%arg5 : memref<1024x128xbf16, #tpu.memory_space<any>>) target(%arg14 : memref<1024x128xbf16, #tpu.memory_space<vmem>>) target_semaphore(%7 : memref<!tpu.dma_semaphore, #tpu.memory_space<semaphore_mem>>)
    %c0 = arith.constant 0 : index
    %c0_0 = arith.constant 0 : index
    %8 = vector.load %arg1[%c0, %c0_0] : memref<8x64xf32, #tpu.memory_space<vmem>>, vector<8x64xf32>
    %c0_i32_1 = arith.constant 0 : i32
    %9 = tpu.memref_slice %arg15[%c0_i32_1] : memref<4x!tpu.dma_semaphore, #tpu.memory_space<semaphore_mem>> -> memref<1x!tpu.dma_semaphore, #tpu.memory_space<semaphore_mem>>
    %10 = tpu.memref_squeeze %9 : memref<1x!tpu.dma_semaphore, #tpu.memory_space<semaphore_mem>> -> memref<!tpu.dma_semaphore, #tpu.memory_space<semaphore_mem>>
    tpu.wait_dma2 semaphore(%10 : memref<!tpu.dma_semaphore, #tpu.memory_space<semaphore_mem>>) src(%arg2 : memref<64x256xbf16, #tpu.memory_space<any>>) dst(%arg11 : memref<64x256xbf16, #tpu.memory_space<vmem>>)
    %11 = arith.truncf %8 : vector<8x64xf32> to vector<8x64xbf16>
    %c0_2 = arith.constant 0 : index
    %c0_3 = arith.constant 0 : index
    %12 = vector.load %arg11[%c0_2, %c0_3] : memref<64x256xbf16, #tpu.memory_space<vmem>>, vector<64x256xbf16>
    %cst = arith.constant dense<0.000000e+00> : vector<8x256xf32>
    %13 = tpu.matmul %11, %12, %cst {dimension_numbers = #tpu.dot_dimension_numbers<[1], [0], [0], [1], [0, 0, 1, 1], [], []>} : vector<8x64xbf16>, vector<64x256xbf16>, vector<8x256xf32> -> vector<8x256xf32>
    %c0_4 = arith.constant 0 : index
    %c0_5 = arith.constant 0 : index
    %14 = vector.load %arg6[%c0_4, %c0_5] : memref<1x256xf32, #tpu.memory_space<vmem>>, vector<1x256xf32>
    %15 = vector.broadcast %14 : vector<1x256xf32> to vector<8x256xf32>
    %16 = arith.addf %13, %15 : vector<8x256xf32>
    %cst_6 = arith.constant 0.000000e+00 : f32
    %17 = vector.broadcast %cst_6 : f32 to vector<8x256xf32>
    %18 = arith.cmpf oge, %16, %17 : vector<8x256xf32>
    %cst_7 = arith.constant 2.000000e-01 : f32
    %19 = vector.broadcast %cst_7 : f32 to vector<8x256xf32>
    %20 = arith.mulf %19, %16 : vector<8x256xf32>
    %21 = arith.select %18, %16, %20 : vector<8x256xi1>, vector<8x256xf32>
    %c1_i32_8 = arith.constant 1 : i32
    %22 = tpu.memref_slice %arg15[%c1_i32_8] : memref<4x!tpu.dma_semaphore, #tpu.memory_space<semaphore_mem>> -> memref<1x!tpu.dma_semaphore, #tpu.memory_space<semaphore_mem>>
    %23 = tpu.memref_squeeze %22 : memref<1x!tpu.dma_semaphore, #tpu.memory_space<semaphore_mem>> -> memref<!tpu.dma_semaphore, #tpu.memory_space<semaphore_mem>>
    tpu.wait_dma2 semaphore(%23 : memref<!tpu.dma_semaphore, #tpu.memory_space<semaphore_mem>>) src(%arg3 : memref<256x512xbf16, #tpu.memory_space<any>>) dst(%arg12 : memref<256x512xbf16, #tpu.memory_space<vmem>>)
    %24 = arith.truncf %21 : vector<8x256xf32> to vector<8x256xbf16>
    %c0_9 = arith.constant 0 : index
    %c0_10 = arith.constant 0 : index
    %25 = vector.load %arg12[%c0_9, %c0_10] : memref<256x512xbf16, #tpu.memory_space<vmem>>, vector<256x512xbf16>
    %cst_11 = arith.constant dense<0.000000e+00> : vector<8x512xf32>
    %26 = tpu.matmul %24, %25, %cst_11 {dimension_numbers = #tpu.dot_dimension_numbers<[1], [0], [0], [1], [0, 0, 1, 1], [], []>} : vector<8x256xbf16>, vector<256x512xbf16>, vector<8x512xf32> -> vector<8x512xf32>
    %c0_12 = arith.constant 0 : index
    %c0_13 = arith.constant 0 : index
    %27 = vector.load %arg7[%c0_12, %c0_13] : memref<1x512xf32, #tpu.memory_space<vmem>>, vector<1x512xf32>
    %28 = vector.broadcast %27 : vector<1x512xf32> to vector<8x512xf32>
    %29 = arith.addf %26, %28 : vector<8x512xf32>
    %cst_14 = arith.constant 0.000000e+00 : f32
    %30 = vector.broadcast %cst_14 : f32 to vector<8x512xf32>
    %31 = arith.cmpf oge, %29, %30 : vector<8x512xf32>
    %cst_15 = arith.constant 2.000000e-01 : f32
    %32 = vector.broadcast %cst_15 : f32 to vector<8x512xf32>
    %33 = arith.mulf %32, %29 : vector<8x512xf32>
    %34 = arith.select %31, %29, %33 : vector<8x512xi1>, vector<8x512xf32>
    %c2_i32_16 = arith.constant 2 : i32
    %35 = tpu.memref_slice %arg15[%c2_i32_16] : memref<4x!tpu.dma_semaphore, #tpu.memory_space<semaphore_mem>> -> memref<1x!tpu.dma_semaphore, #tpu.memory_space<semaphore_mem>>
    %36 = tpu.memref_squeeze %35 : memref<1x!tpu.dma_semaphore, #tpu.memory_space<semaphore_mem>> -> memref<!tpu.dma_semaphore, #tpu.memory_space<semaphore_mem>>
    tpu.wait_dma2 semaphore(%36 : memref<!tpu.dma_semaphore, #tpu.memory_space<semaphore_mem>>) src(%arg4 : memref<512x1024xbf16, #tpu.memory_space<any>>) dst(%arg13 : memref<512x1024xbf16, #tpu.memory_space<vmem>>)
    %37 = arith.truncf %34 : vector<8x512xf32> to vector<8x512xbf16>
    %c0_17 = arith.constant 0 : index
    %c0_18 = arith.constant 0 : index
    %38 = vector.load %arg13[%c0_17, %c0_18] : memref<512x1024xbf16, #tpu.memory_space<vmem>>, vector<512x1024xbf16>
    %cst_19 = arith.constant dense<0.000000e+00> : vector<8x1024xf32>
    %39 = tpu.matmul %37, %38, %cst_19 {dimension_numbers = #tpu.dot_dimension_numbers<[1], [0], [0], [1], [0, 0, 1, 1], [], []>} : vector<8x512xbf16>, vector<512x1024xbf16>, vector<8x1024xf32> -> vector<8x1024xf32>
    %c0_20 = arith.constant 0 : index
    %c0_21 = arith.constant 0 : index
    %40 = vector.load %arg8[%c0_20, %c0_21] : memref<1x1024xf32, #tpu.memory_space<vmem>>, vector<1x1024xf32>
    %41 = vector.broadcast %40 : vector<1x1024xf32> to vector<8x1024xf32>
    %42 = arith.addf %39, %41 : vector<8x1024xf32>
    %cst_22 = arith.constant 0.000000e+00 : f32
    %43 = vector.broadcast %cst_22 : f32 to vector<8x1024xf32>
    %44 = arith.cmpf oge, %42, %43 : vector<8x1024xf32>
    %cst_23 = arith.constant 2.000000e-01 : f32
    %45 = vector.broadcast %cst_23 : f32 to vector<8x1024xf32>
    %46 = arith.mulf %45, %42 : vector<8x1024xf32>
    %47 = arith.select %44, %42, %46 : vector<8x1024xi1>, vector<8x1024xf32>
    %c3_i32_24 = arith.constant 3 : i32
    %48 = tpu.memref_slice %arg15[%c3_i32_24] : memref<4x!tpu.dma_semaphore, #tpu.memory_space<semaphore_mem>> -> memref<1x!tpu.dma_semaphore, #tpu.memory_space<semaphore_mem>>
    %49 = tpu.memref_squeeze %48 : memref<1x!tpu.dma_semaphore, #tpu.memory_space<semaphore_mem>> -> memref<!tpu.dma_semaphore, #tpu.memory_space<semaphore_mem>>
    tpu.wait_dma2 semaphore(%49 : memref<!tpu.dma_semaphore, #tpu.memory_space<semaphore_mem>>) src(%arg5 : memref<1024x128xbf16, #tpu.memory_space<any>>) dst(%arg14 : memref<1024x128xbf16, #tpu.memory_space<vmem>>)
    %50 = arith.truncf %47 : vector<8x1024xf32> to vector<8x1024xbf16>
    %c0_25 = arith.constant 0 : index
    %c0_26 = arith.constant 0 : index
    %51 = vector.load %arg14[%c0_25, %c0_26] : memref<1024x128xbf16, #tpu.memory_space<vmem>>, vector<1024x128xbf16>
    %cst_27 = arith.constant dense<0.000000e+00> : vector<8x128xf32>
    %52 = tpu.matmul %50, %51, %cst_27 {dimension_numbers = #tpu.dot_dimension_numbers<[1], [0], [0], [1], [0, 0, 1, 1], [], []>} : vector<8x1024xbf16>, vector<1024x128xbf16>, vector<8x128xf32> -> vector<8x128xf32>
    %c0_28 = arith.constant 0 : index
    %c0_29 = arith.constant 0 : index
    %53 = vector.load %arg9[%c0_28, %c0_29] : memref<1x128xf32, #tpu.memory_space<vmem>>, vector<1x128xf32>
    %54 = vector.broadcast %53 : vector<1x128xf32> to vector<8x128xf32>
    %55 = arith.addf %52, %54 : vector<8x128xf32>
    %56 = math.tanh %55 : vector<8x128xf32>
    %c0_30 = arith.constant 0 : index
    %c0_31 = arith.constant 0 : index
    %57 = vector.load %arg10[%c0_30, %c0_31] : memref<8x128xf32, #tpu.memory_space<vmem>>, vector<8x128xf32>
    tpu.vector_store %arg10[%c0_30, %c0_31], %56 {strides = array<i32>} : memref<8x128xf32, #tpu.memory_space<vmem>>, vector<8x128xf32>,
    return
  }
  func.func @transform_0(%arg0: i32) -> (i32, i32) {
    %c0_i32 = arith.constant 0 : i32
    %c0_i32_0 = arith.constant 0 : i32
    %c0_i32_1 = arith.constant 0 : i32
    return %c0_i32, %c0_i32_0 : i32, i32
  }
  func.func @transform_5(%arg0: i32) -> (i32, i32) {
    %c0_i32 = arith.constant 0 : i32
    %c0_i32_0 = arith.constant 0 : i32
    %c0_i32_1 = arith.constant 0 : i32
    return %c0_i32, %c0_i32_0 : i32, i32
  }
  func.func @transform_6(%arg0: i32) -> (i32, i32) {
    %c0_i32 = arith.constant 0 : i32
    %c0_i32_0 = arith.constant 0 : i32
    %c0_i32_1 = arith.constant 0 : i32
    return %c0_i32, %c0_i32_0 : i32, i32
  }
  func.func @transform_7(%arg0: i32) -> (i32, i32) {
    %c0_i32 = arith.constant 0 : i32
    %c0_i32_0 = arith.constant 0 : i32
    %c0_i32_1 = arith.constant 0 : i32
    return %c0_i32, %c0_i32_0 : i32, i32
  }
  func.func @transform_8(%arg0: i32) -> (i32, i32) {
    %c0_i32 = arith.constant 0 : i32
    %c0_i32_0 = arith.constant 0 : i32
    %c0_i32_1 = arith.constant 0 : i32
    return %c0_i32, %c0_i32_0 : i32, i32
  }
  func.func @transform_9(%arg0: i32) -> (i32, i32) {
    %c0_i32 = arith.constant 0 : i32
    %c0_i32_0 = arith.constant 0 : i32
    %c0_i32_1 = arith.constant 0 : i32
    return %c0_i32, %c0_i32_0 : i32, i32
  }
}

</mosaic_0001>

<bundles_post_ra>
// kernel: generator_forward.1
= control target key start
LH: loop header
LB: loop body
LE: loop exit
PB: predicated region body
PF: predicated region fallthrough
CT: control target
= control target key end

     0   :  { %14 = vsyncpa [#allocation8], 0  ;;  %s30_s30 = sld [smem:[#allocation0]]   ;;  %s1550_s10 = smov [#allocation2]   ;;  %s1783_s0 = inlined_call_operand.vmem [shape: f32[8,64], index: 0, kind: input, shape index: {}]   ;;  %s1784_s1 = inlined_call_operand.hbm [shape: bf16[64,256], index: 1, kind: input, shape index: {}]   ;;  %s1785_s2 = inlined_call_operand.hbm [shape: bf16[256,512], index: 2, kind: input, shape index: {}]   ;;  %s1786_s3 = inlined_call_operand.hbm [shape: bf16[512,1024], index: 3, kind: input, shape index: {}]   ;;  %s1787_s4 = inlined_call_operand.hbm [shape: bf16[1024,128], index: 4, kind: input, shape index: {}]   ;;  %s1788_s5 = inlined_call_operand.vmem [shape: f32[1,256], index: 5, kind: input, shape index: {}]   ;;  %s1789_s6 = inlined_call_operand.vmem [shape: f32[1,512], index: 6, kind: input, shape index: {}]   ;;  %s1790_s7 = inlined_call_operand.vmem [shape: f32[1,1024], index: 7, kind: input, shape index: {}]   ;;  %s1791_s8 = inlined_call_operand.vmem [shape: f32[1,128], index: 8, kind: input, shape index: {}]   ;;  %s1792_s9 = inlined_call_operand.hbm [shape: f32[8,128], index: 9, kind: output, shape index: {}]  }
   0x1   :  { %s38_s11 = sshll.u32 %s1550_s10, 4  ;;  %s1551_s12 = smov 256   ;;  %s39_s11 = int_to_ptr.vmem [resolvable:$true] %s38_s11 }
   0x2   :  { %42 = sst [smem:[#allocation10]] %s1551_s12  ;;  %s1552_s13 = smov 2  }
   0x3   :  { %44 = sst [smem:[#allocation10 + $0x1]] %s1551_s12  ;;  %s1553_s14 = smov 64  }
   0x4   :  { %46 = sst [smem:[#allocation10 + $0x2]] %s1552_s13  ;;  %s1554_s16 = smov 128  }
   0x5   :  { %48 = sst [smem:[#allocation10 + $0x3]] %s1553_s14  ;;  %s1555_s18 = smov 4  }
   0x6   :  { %s1350_s15 = sshll.u32 %s30_s30, 26  ;;  %50 = sst [smem:[#allocation10 + $0x4]] %s1554_s16 }
   0x7   :  { %s1623_s17 = sadd.s32 134217728, %s1350_s15  ;;  %52 = sst [smem:[#allocation10 + $0x5]] %s1552_s13 }
   0x8   :  { %54 = sst [smem:[#allocation10 + $0x6]] %s1554_s16  ;;  %s1556_s19 = smov [#allocation6]  }
   0x9   :  { %56 = sst [smem:[#allocation10 + $0x7]] %s1553_s14  ;;  %s1557_s20 = smov [#allocation9]  }
   0xa   :  { %58 = sst [smem:[#allocation10 + $0x8]] %s1555_s18  ;;  %s1558_s23 = smov 512  }
   0xb   :  { %60 = dma.general %s1784_s1, 1024, %s39_s11, %s1556_s19, %s1557_s20, [#allocation10], %s1623_s17, 0  }
   0xc   :  { %81 = sst [smem:[#allocation12 + $0x2]] %s1555_s18  ;;  %s1559_s24 = smov [#allocation3]  }
   0xd   :  { %77 = sst [smem:[#allocation12]] %s1558_s23  ;;  %s73_s25 = sshll.u32 %s1559_s24, 4  ;;  %s74_s25 = int_to_ptr.vmem [resolvable:$true] %s73_s25 }
   0xe   :  { %79 = sst [smem:[#allocation12 + $0x1]] %s1558_s23  ;;  %s1560_s1 = smov [#allocation6 + $0x1]  }
   0xf   :  { %83 = sst [smem:[#allocation12 + $0x3]] %s1553_s14  ;;  %s1561_s26 = smov [#allocation11]  }
  0x10   :  { %85 = sst [smem:[#allocation12 + $0x4]] %s1554_s16  ;;  %s1562_s29 = smov 1024  }
  0x11   :  { %87 = sst [smem:[#allocation12 + $0x5]] %s1552_s13  ;;  %s1563_s30 = smov [#allocation4]  }
  0x12   :  { %89 = sst [smem:[#allocation12 + $0x6]] %s1551_s12  ;;  %s108_s10 = sshll.u32 %s1563_s30, 4  ;;  %s109_s10 = int_to_ptr.vmem [resolvable:$true] %s108_s10 }
  0x13   :  { %91 = sst [smem:[#allocation12 + $0x7]] %s1553_s14  ;;  %s1564_s11 = smov 8  }
  0x14   :  { %93 = sst [smem:[#allocation12 + $0x8]] %s1555_s18  ;;  %s1565_s12 = smov [#allocation5]  }
  0x15   :  { %95 = dma.general %s1785_s2, 8192, %s74_s25, %s1560_s1, %s1561_s26, [#allocation12], %s1623_s17, 0  }
  0x16   :  { %112 = sst [smem:[#allocation14]] %s1562_s29  ;;  %s139_s15 = sshll.u32 %s1565_s12, 4  ;;  %s140_s15 = int_to_ptr.vmem [resolvable:$true] %s139_s15 }
  0x17   :  { %114 = sst [smem:[#allocation14 + $0x1]] %s1562_s29  ;;  %s1566_s2 = smov [#allocation6 + $0x2]  }
  0x18   :  { %116 = sst [smem:[#allocation14 + $0x2]] %s1564_s11  ;;  %s1567_s19 = smov [#allocation13]  }
  0x19   :  { %118 = sst [smem:[#allocation14 + $0x3]] %s1553_s14 }
  0x1a   :  { %120 = sst [smem:[#allocation14 + $0x4]] %s1554_s16  ;;  %s1496_s16 = scalar_lea.hbm %s1787_s4, 8192 }
  0x1b   :  { %122 = sst [smem:[#allocation14 + $0x5]] %s1552_s13  ;;  %p1497_p0 = scmp.ne.s32.totalorder %s1787_s4, %s1496_s16 }
  0x1c   :  { %124 = sst [smem:[#allocation14 + $0x6]] %s1558_s23  ;;  %p1500_p1 = scmp.lt.u32.totalorder %s1496_s16, %s1787_s4 }
  0x1d   :  { %126 = sst [smem:[#allocation14 + $0x7]] %s1553_s14 }
  0x1e   :  { %128 = sst [smem:[#allocation14 + $0x8]] %s1555_s18  ;;  %p1502_p2 = pnand %p1500_p1, %p1497_p0 }
  0x1f   :  { %130 = dma.general %s1786_s3, 32768, %s109_s10, %s1566_s2, %s1567_s19, [#allocation14], %s1623_s17, 0  }
  0x20   :  { %1505 = shalt.err (!%p1502_p2)  }
  0x21   :  { %s1506_s14 = scalar_lea.vmem %s140_s15, 8192  ;;  %p1511_p4 = scmp.lt.s32.totalorder %s140_s15, %s140_s15 }
  0x22   :  { %p1507_p3 = scmp.ne.s32.totalorder %s140_s15, %s1506_s14  ;;  %p1512_p5 = scmp.lt.s32.totalorder %s1506_s14, %s1506_s14 }
  0x24   :  { %p1513_p6 = por %p1512_p5, %p1511_p4 }
  0x26   :  { %p1514_p7 = pnand %p1513_p6, %p1507_p3 }
  0x28   :  { %1517 = shalt.err (!%p1514_p7)  }
  0x29   :  { %142 = dma.hbm_to_vmem [thread:$0]  %s1787_s4, 8192, %s140_s15, [#allocation6 + $0x3]  ;;  %v143_v0 = vld [vmem:[%s1783_s0] sm:$0xff] }
  0x2a   :  { %1540 = dma.done.wait [#allocation6], 1024 }
  0x2b   :  { %1541 = vsyncadd [#allocation6], 4294966272  ;;  %v1568_v1 = vmov 0   ;;  %v150_v2 = vld [vmem:[#allocation2 + $0x8] sm:$0xff]  ;;  %v149_v3 = vld [vmem:[#allocation2] sm:$0xff]  ;;  %v148_v10 = vpack.c.bf16 %v143_v0, %v143_v0  ;;  %vm169_vm0 = vcmask 523264   ;;  %v159_v11 = vlaneseq }
  0x2c   :  { %205 = vmatprep.mubr.bf16.mxu0 %v1568_v1  ;;  %v152_v4 = vld [vmem:[#allocation2 + $0x18] sm:$0xff]  ;;  %173 = vmatprep.subr.bf16.mxu0 %v150_v2  ;;  %v151_v5 = vld [vmem:[#allocation2 + $0x10] sm:$0xff]  ;;  %v154_v6 = vld [vmem:[#allocation2 + $0x28] sm:$0xff] }
  0x2d   :  { %174 = vmatpush1.bf16.msra.mxu0 %v149_v3  ;;  %v153_v7 = vld [vmem:[#allocation2 + $0x20] sm:$0xff]  ;;  %v156_v8 = vld [vmem:[#allocation2 + $0x38] sm:$0xff]  ;;  %v155_v9 = vld [vmem:[#allocation2 + $0x30] sm:$0xff]  ;;  %v1667_v12 = vshrl.u32 %v159_v11, 7 }
  0x2e   :  { %175 = vmatprep.subr.bf16.mxu0 %v152_v4  ;;  %v157_v14 = vld [vmem:[%s1788_s5] sm:$0x3] }
  0x2f   :  { %v1670_v13 = vsub.s32 0, %v1667_v12  ;;  %v1676_v15 = vsub.s32 1, %v1667_v12 }
  0x31   :  { %176 = vmatpush1.bf16.msra.mxu0 %v151_v5  ;;  %v162_v16 = vrot.slane %v157_v14, %v1670_v13  ;;  %v166_v17 = vrot.slane %v157_v14, %v1676_v15 }
  0x32   :  { %177 = vmatprep.subr.bf16.mxu0 %v154_v6 }
  0x35   :  { %178 = vmatpush1.bf16.msra.mxu0 %v153_v7 }
  0x36   :  { %179 = vmatprep.subr.bf16.mxu0 %v156_v8 }
  0x39   :  { %180 = vmatpush1.bf16.msra.mxu0 %v155_v9 }
  0x3c   :  { %1356 = vmatmul.mubr.msk.bf16.vlgmr.msra.gmra.mrb[0].mxu0 %vm169_vm0, %v148_v10 }
 0x10f   :  { %v207_v18 = vpop.f32.mrb[0].mxu0 }
 0x110   :  { %v208_v19 = vadd.f32 %v207_v18, %v162_v16  ;;  %v209_v20 = vpop.f32.mrb[1].mxu0 }
 0x111   :  { %v210_v21 = vadd.f32 %v209_v20, %v166_v17  ;;  %v211_v22 = vpop.f32.mrb[2].mxu0 }
 0x112   :  { %vm214_vm1 = vcmp.ge.f32.partialorder %v208_v19, 0.0  ;;  %v216_v23 = vmul.f32 0.2, %v208_v19  ;;  %v212_v24 = vpop.f32.mrb[3].mxu0 }
 0x113   :  { %vm215_vm2 = vcmp.ge.f32.partialorder %v210_v21, 0.0  ;;  %v217_v25 = vmul.f32 0.2, %v210_v21 }
 0x114   :  { %v1680_v26 = vsel %vm214_vm1, %v208_v19, %v216_v23 }
 0x115   :  { %v219_v27 = vsel %vm215_vm2, %v210_v21, %v217_v25 }
 0x116   :  { %1542 = dma.done.wait [#allocation6 + $0x1], 8192 }
 0x117   :  { %1543 = vsyncadd [#allocation6 + $0x1], 4294959104  ;;  %v225_v28 = vpack.c.bf16 %v219_v27, %v219_v27  ;;  %v227_v29 = vld [vmem:[#allocation3 + $0x8] sm:$0xff]  ;;  %v229_v30 = vld [vmem:[#allocation3 + $0x18] sm:$0xff] }
 0x118   :  { %v226_v31 = vld [vmem:[#allocation3] sm:$0xff]  ;;  %312 = vmatprep.subr.bf16.mxu1 %v227_v29  ;;  %353 = vmatprep.subr.bf16.mxu0 %v229_v30  ;;  %v228_v32 = vld [vmem:[#allocation3 + $0x10] sm:$0xff]  ;;  %v231_v33 = vld [vmem:[#allocation3 + $0x28] sm:$0xff] }
 0x119   :  { %344 = vmatprep.mubr.bf16.mxu1 %v225_v28  ;;  %385 = vmatprep.mubr.bf16.mxu0 %v225_v28  ;;  %v233_v34 = vld [vmem:[#allocation3 + $0x38] sm:$0xff]  ;;  %v230_v35 = vld [vmem:[#allocation3 + $0x20] sm:$0xff]  ;;  %v232_v36 = vld [vmem:[#allocation3 + $0x30] sm:$0xff] }
 0x11a   :  { %313 = vmatpush1.bf16.msra.mxu1 %v226_v31  ;;  %354 = vmatpush1.bf16.msra.mxu0 %v228_v32  ;;  %v235_v37 = vld [vmem:[#allocation3 + $0x48] sm:$0xff]  ;;  %v237_v38 = vld [vmem:[#allocation3 + $0x58] sm:$0xff]  ;;  %v234_v39 = vld [vmem:[#allocation3 + $0x40] sm:$0xff] }
 0x11b   :  { %314 = vmatprep.subr.bf16.mxu1 %v231_v33  ;;  %355 = vmatprep.subr.bf16.mxu0 %v233_v34  ;;  %v236_v40 = vld [vmem:[#allocation3 + $0x50] sm:$0xff]  ;;  %v239_v41 = vld [vmem:[#allocation3 + $0x68] sm:$0xff]  ;;  %v241_v42 = vld [vmem:[#allocation3 + $0x78] sm:$0xff]  ;;  %v224_v33 = vpack.c.bf16 %v1680_v26, %v1680_v26  ;;  %v302_v34 = vsub.s32 2, %v1667_v12 }
 0x11c   :  { %v238_v43 = vld [vmem:[#allocation3 + $0x60] sm:$0xff]  ;;  %v240_v44 = vld [vmem:[#allocation3 + $0x70] sm:$0xff]  ;;  %v243_v45 = vld [vmem:[#allocation3 + $0x88] sm:$0xff] }
 0x11d   :  { %v245_v46 = vld [vmem:[#allocation3 + $0x98] sm:$0xff]  ;;  %v242_v47 = vld [vmem:[#allocation3 + $0x80] sm:$0xff]  ;;  %v244_v48 = vld [vmem:[#allocation3 + $0x90] sm:$0xff] }
 0x11e   :  { %315 = vmatpush1.bf16.msra.mxu1 %v230_v35  ;;  %356 = vmatpush1.bf16.msra.mxu0 %v232_v36  ;;  %v247_v49 = vld [vmem:[#allocation3 + $0xa8] sm:$0xff]  ;;  %v249_v50 = vld [vmem:[#allocation3 + $0xb8] sm:$0xff]  ;;  %v246_v51 = vld [vmem:[#allocation3 + $0xa0] sm:$0xff]  ;;  %v306_v36 = vsub.s32 3, %v1667_v12 }
 0x11f   :  { %316 = vmatprep.subr.bf16.mxu1 %v235_v37  ;;  %357 = vmatprep.subr.bf16.mxu0 %v237_v38  ;;  %v248_v52 = vld [vmem:[#allocation3 + $0xb0] sm:$0xff]  ;;  %v251_v53 = vld [vmem:[#allocation3 + $0xc8] sm:$0xff]  ;;  %v253_v54 = vld [vmem:[#allocation3 + $0xd8] sm:$0xff] }
 0x120   :  { %v250_v55 = vld [vmem:[#allocation3 + $0xc0] sm:$0xff]  ;;  %v252_v56 = vld [vmem:[#allocation3 + $0xd0] sm:$0xff]  ;;  %v255_v57 = vld [vmem:[#allocation3 + $0xe8] sm:$0xff] }
 0x121   :  { %v257_v58 = vld [vmem:[#allocation3 + $0xf8] sm:$0xff]  ;;  %v254_v59 = vld [vmem:[#allocation3 + $0xe0] sm:$0xff]  ;;  %v256_v60 = vld [vmem:[#allocation3 + $0xf0] sm:$0xff] }
 0x122   :  { %317 = vmatpush1.bf16.msra.mxu1 %v234_v39  ;;  %358 = vmatpush1.bf16.msra.mxu0 %v236_v40  ;;  %v259_v61 = vld [vmem:[#allocation3 + $0x108] sm:$0xff]  ;;  %v261_v62 = vld [vmem:[#allocation3 + $0x118] sm:$0xff]  ;;  %v258_v63 = vld [vmem:[#allocation3 + $0x100] sm:$0xff] }
 0x123   :  { %318 = vmatprep.subr.bf16.mxu1 %v239_v41  ;;  %359 = vmatprep.subr.bf16.mxu0 %v241_v42  ;;  %v260_v0 = vld [vmem:[#allocation3 + $0x110] sm:$0xff]  ;;  %v263_v1 = vld [vmem:[#allocation3 + $0x128] sm:$0xff]  ;;  %v265_v2 = vld [vmem:[#allocation3 + $0x138] sm:$0xff] }
 0x124   :  { %v262_v3 = vld [vmem:[#allocation3 + $0x120] sm:$0xff]  ;;  %v264_v4 = vld [vmem:[#allocation3 + $0x130] sm:$0xff]  ;;  %v267_v5 = vld [vmem:[#allocation3 + $0x148] sm:$0xff] }
 0x125   :  { %v269_v6 = vld [vmem:[#allocation3 + $0x158] sm:$0xff]  ;;  %v266_v7 = vld [vmem:[#allocation3 + $0x140] sm:$0xff]  ;;  %v268_v8 = vld [vmem:[#allocation3 + $0x150] sm:$0xff] }
 0x126   :  { %319 = vmatpush1.bf16.msra.mxu1 %v238_v43  ;;  %360 = vmatpush1.bf16.msra.mxu0 %v240_v44  ;;  %v271_v9 = vld [vmem:[#allocation3 + $0x168] sm:$0xff]  ;;  %v273_v10 = vld [vmem:[#allocation3 + $0x178] sm:$0xff]  ;;  %v270_v11 = vld [vmem:[#allocation3 + $0x160] sm:$0xff] }
 0x127   :  { %320 = vmatprep.subr.bf16.mxu1 %v243_v45  ;;  %361 = vmatprep.subr.bf16.mxu0 %v245_v46  ;;  %v272_v14 = vld [vmem:[#allocation3 + $0x170] sm:$0xff]  ;;  %v275_v16 = vld [vmem:[#allocation3 + $0x188] sm:$0xff]  ;;  %v277_v17 = vld [vmem:[#allocation3 + $0x198] sm:$0xff] }
 0x128   :  { %v274_v18 = vld [vmem:[#allocation3 + $0x180] sm:$0xff]  ;;  %v276_v19 = vld [vmem:[#allocation3 + $0x190] sm:$0xff]  ;;  %v279_v20 = vld [vmem:[#allocation3 + $0x1a8] sm:$0xff] }
 0x129   :  { %v281_v21 = vld [vmem:[#allocation3 + $0x1b8] sm:$0xff]  ;;  %v278_v22 = vld [vmem:[#allocation3 + $0x1a0] sm:$0xff]  ;;  %v280_v23 = vld [vmem:[#allocation3 + $0x1b0] sm:$0xff] }
 0x12a   :  { %321 = vmatpush1.bf16.msra.mxu1 %v242_v47  ;;  %362 = vmatpush1.bf16.msra.mxu0 %v244_v48  ;;  %v283_v24 = vld [vmem:[#allocation3 + $0x1c8] sm:$0xff]  ;;  %v285_v25 = vld [vmem:[#allocation3 + $0x1d8] sm:$0xff]  ;;  %v282_v27 = vld [vmem:[#allocation3 + $0x1c0] sm:$0xff] }
 0x12b   :  { %322 = vmatprep.subr.bf16.mxu1 %v247_v49  ;;  %363 = vmatprep.subr.bf16.mxu0 %v249_v50  ;;  %v284_v28 = vld [vmem:[#allocation3 + $0x1d0] sm:$0xff]  ;;  %v287_v29 = vld [vmem:[#allocation3 + $0x1e8] sm:$0xff]  ;;  %v289_v30 = vld [vmem:[#allocation3 + $0x1f8] sm:$0xff] }
 0x12c   :  { %v286_v31 = vld [vmem:[#allocation3 + $0x1e0] sm:$0xff]  ;;  %v288_v32 = vld [vmem:[#allocation3 + $0x1f0] sm:$0xff] }
 0x12d   :  { %v290_v35 = vld [vmem:[%s1789_s6] sm:$0xf] }
 0x12e   :  { %323 = vmatpush1.bf16.msra.mxu1 %v246_v51  ;;  %364 = vmatpush1.bf16.msra.mxu0 %v248_v52  ;;  %v295_v37 = vrot.slane %v290_v35, %v1670_v13  ;;  %v303_v38 = vrot.slane %v290_v35, %v302_v34  ;;  %v299_v39 = vrot.slane %v290_v35, %v1676_v15 }
 0x12f   :  { %324 = vmatprep.subr.bf16.mxu1 %v251_v53  ;;  %365 = vmatprep.subr.bf16.mxu0 %v253_v54  ;;  %v307_v26 = vrot.slane %v290_v35, %v306_v36 }
 0x132   :  { %325 = vmatpush1.bf16.msra.mxu1 %v250_v55  ;;  %366 = vmatpush1.bf16.msra.mxu0 %v252_v56 }
 0x133   :  { %326 = vmatprep.subr.bf16.mxu1 %v255_v57  ;;  %367 = vmatprep.subr.bf16.mxu0 %v257_v58 }
 0x136   :  { %327 = vmatpush1.bf16.msra.mxu1 %v254_v59  ;;  %368 = vmatpush1.bf16.msra.mxu0 %v256_v60 }
 0x137   :  { %328 = vmatprep.subr.bf16.mxu1 %v259_v61  ;;  %369 = vmatprep.subr.bf16.mxu0 %v261_v62 }
 0x13a   :  { %329 = vmatpush1.bf16.msra.mxu1 %v258_v63  ;;  %370 = vmatpush1.bf16.msra.mxu0 %v260_v0 }
 0x13b   :  { %330 = vmatprep.subr.bf16.mxu1 %v263_v1  ;;  %371 = vmatprep.subr.bf16.mxu0 %v265_v2 }
 0x13e   :  { %331 = vmatpush1.bf16.msra.mxu1 %v262_v3  ;;  %372 = vmatpush1.bf16.msra.mxu0 %v264_v4 }
 0x13f   :  { %332 = vmatprep.subr.bf16.mxu1 %v267_v5  ;;  %373 = vmatprep.subr.bf16.mxu0 %v269_v6 }
 0x142   :  { %333 = vmatpush1.bf16.msra.mxu1 %v266_v7  ;;  %374 = vmatpush1.bf16.msra.mxu0 %v268_v8 }
 0x143   :  { %334 = vmatprep.subr.bf16.mxu1 %v271_v9  ;;  %375 = vmatprep.subr.bf16.mxu0 %v273_v10 }
 0x146   :  { %335 = vmatpush1.bf16.msra.mxu1 %v270_v11  ;;  %376 = vmatpush1.bf16.msra.mxu0 %v272_v14 }
 0x147   :  { %336 = vmatprep.subr.bf16.mxu1 %v275_v16  ;;  %377 = vmatprep.subr.bf16.mxu0 %v277_v17 }
 0x14a   :  { %337 = vmatpush1.bf16.msra.mxu1 %v274_v18  ;;  %378 = vmatpush1.bf16.msra.mxu0 %v276_v19 }
 0x14b   :  { %338 = vmatprep.subr.bf16.mxu1 %v279_v20  ;;  %379 = vmatprep.subr.bf16.mxu0 %v281_v21 }
 0x14e   :  { %339 = vmatpush1.bf16.msra.mxu1 %v278_v22  ;;  %380 = vmatpush1.bf16.msra.mxu0 %v280_v23 }
 0x14f   :  { %340 = vmatprep.subr.bf16.mxu1 %v283_v24  ;;  %381 = vmatprep.subr.bf16.mxu0 %v285_v25 }
 0x152   :  { %341 = vmatpush1.bf16.msra.mxu1 %v282_v27  ;;  %382 = vmatpush1.bf16.msra.mxu0 %v284_v28 }
 0x153   :  { %342 = vmatprep.subr.bf16.mxu1 %v287_v29  ;;  %383 = vmatprep.subr.bf16.mxu0 %v289_v30 }
 0x156   :  { %343 = vmatpush1.bf16.msra.mxu1 %v286_v31  ;;  %384 = vmatpush1.bf16.msra.mxu0 %v288_v32 }
 0x159   :  { %345 = vmatmul.mubr.bf16.vlgmr.msra.gmra.mrb[0].mxu1 %v224_v33  ;;  %386 = vmatmul.mubr.bf16.vlgmr.msra.gmra.mrb[4].mxu0 %v224_v33 }
 0x22c   :  { %v346_v40 = vpop.f32.mrb[0].mxu1  ;;  %v387_v41 = vpop.f32.mrb[4].mxu0 }
 0x22d   :  { %v347_v42 = vadd.f32 %v346_v40, %v295_v37  ;;  %v388_v43 = vadd.f32 %v387_v41, %v303_v38  ;;  %v348_v44 = vpop.f32.mrb[1].mxu1  ;;  %v389_v45 = vpop.f32.mrb[5].mxu0 }
 0x22e   :  { %v349_v46 = vadd.f32 %v348_v44, %v299_v39  ;;  %v390_v47 = vadd.f32 %v389_v45, %v307_v26  ;;  %v350_v48 = vpop.f32.mrb[2].mxu1  ;;  %v391_v49 = vpop.f32.mrb[6].mxu0 }
 0x22f   :  { %vm394_vm3 = vcmp.ge.f32.partialorder %v347_v42, 0.0  ;;  %v398_v50 = vmul.f32 0.2, %v347_v42  ;;  %vm396_vm4 = vcmp.ge.f32.partialorder %v388_v43, 0.0  ;;  %v400_v51 = vmul.f32 0.2, %v388_v43 }
 0x230   :  { %vm395_vm5 = vcmp.ge.f32.partialorder %v349_v46, 0.0  ;;  %v399_v52 = vmul.f32 0.2, %v349_v46  ;;  %vm397_vm6 = vcmp.ge.f32.partialorder %v390_v47, 0.0  ;;  %v401_v53 = vmul.f32 0.2, %v390_v47 }
 0x231   :  { %v1695_v54 = vsel %vm394_vm3, %v347_v42, %v398_v50  ;;  %v1697_v55 = vsel %vm396_vm4, %v388_v43, %v400_v51  ;;  %v351_v56 = vpop.f32.mrb[3].mxu1  ;;  %v392_v57 = vpop.f32.mrb[7].mxu0 }
 0x232   :  { %v403_v58 = vsel %vm395_vm5, %v349_v46, %v399_v52  ;;  %v1699_v59 = vsel %vm397_vm6, %v390_v47, %v401_v53 }
 0x233   :  { %1544 = dma.done.wait [#allocation6 + $0x2], 32768 }
 0x234   :  { %1545 = vsyncadd [#allocation6 + $0x2], 4294934528  ;;  %v1701_v60 = vpack.c.bf16 %v403_v58, %v403_v58  ;;  %v415_v61 = vld [vmem:[#allocation4 + $0x8] sm:$0xff]  ;;  %v417_v62 = vld [vmem:[#allocation4 + $0x18] sm:$0xff] }
 0x235   :  { %v414_v63 = vld [vmem:[#allocation4] sm:$0xff]  ;;  %712 = vmatprep.subr.bf16.mxu1 %v415_v61  ;;  %794 = vmatprep.subr.bf16.mxu0 %v417_v62  ;;  %v416_v0 = vld [vmem:[#allocation4 + $0x10] sm:$0xff]  ;;  %v423_v1 = vld [vmem:[#allocation4 + $0x48] sm:$0xff] }
 0x236   :  { %744 = vmatprep.mubr.bf16.mxu1 %v1701_v60  ;;  %826 = vmatprep.mubr.bf16.mxu0 %v1701_v60  ;;  %v425_v2 = vld [vmem:[#allocation4 + $0x58] sm:$0xff]  ;;  %v422_v3 = vld [vmem:[#allocation4 + $0x40] sm:$0xff]  ;;  %v424_v4 = vld [vmem:[#allocation4 + $0x50] sm:$0xff] }
 0x237   :  { %713 = vmatpush1.bf16.msra.mxu1 %v414_v63  ;;  %795 = vmatpush1.bf16.msra.mxu0 %v416_v0  ;;  %v431_v5 = vld [vmem:[#allocation4 + $0x88] sm:$0xff]  ;;  %v433_v6 = vld [vmem:[#allocation4 + $0x98] sm:$0xff]  ;;  %v430_v7 = vld [vmem:[#allocation4 + $0x80] sm:$0xff] }
 0x238   :  { %714 = vmatprep.subr.bf16.mxu1 %v423_v1  ;;  %796 = vmatprep.subr.bf16.mxu0 %v425_v2  ;;  %v432_v8 = vld [vmem:[#allocation4 + $0x90] sm:$0xff]  ;;  %v439_v9 = vld [vmem:[#allocation4 + $0xc8] sm:$0xff]  ;;  %v441_v10 = vld [vmem:[#allocation4 + $0xd8] sm:$0xff] }
 0x239   :  { %v438_v11 = vld [vmem:[#allocation4 + $0xc0] sm:$0xff]  ;;  %v440_v14 = vld [vmem:[#allocation4 + $0xd0] sm:$0xff]  ;;  %v447_v16 = vld [vmem:[#allocation4 + $0x108] sm:$0xff] }
 0x23a   :  { %v449_v17 = vld [vmem:[#allocation4 + $0x118] sm:$0xff]  ;;  %v446_v18 = vld [vmem:[#allocation4 + $0x100] sm:$0xff]  ;;  %v448_v19 = vld [vmem:[#allocation4 + $0x110] sm:$0xff] }
 0x23b   :  { %715 = vmatpush1.bf16.msra.mxu1 %v422_v3  ;;  %797 = vmatpush1.bf16.msra.mxu0 %v424_v4  ;;  %v455_v20 = vld [vmem:[#allocation4 + $0x148] sm:$0xff]  ;;  %v457_v21 = vld [vmem:[#allocation4 + $0x158] sm:$0xff]  ;;  %v454_v22 = vld [vmem:[#allocation4 + $0x140] sm:$0xff] }
 0x23c   :  { %716 = vmatprep.subr.bf16.mxu1 %v431_v5  ;;  %798 = vmatprep.subr.bf16.mxu0 %v433_v6  ;;  %v456_v23 = vld [vmem:[#allocation4 + $0x150] sm:$0xff]  ;;  %v463_v24 = vld [vmem:[#allocation4 + $0x188] sm:$0xff]  ;;  %v465_v25 = vld [vmem:[#allocation4 + $0x198] sm:$0xff] }
 0x23d   :  { %v462_v27 = vld [vmem:[#allocation4 + $0x180] sm:$0xff]  ;;  %v464_v28 = vld [vmem:[#allocation4 + $0x190] sm:$0xff]  ;;  %v471_v29 = vld [vmem:[#allocation4 + $0x1c8] sm:$0xff] }
 0x23e   :  { %v473_v30 = vld [vmem:[#allocation4 + $0x1d8] sm:$0xff]  ;;  %v470_v31 = vld [vmem:[#allocation4 + $0x1c0] sm:$0xff]  ;;  %v472_v32 = vld [vmem:[#allocation4 + $0x1d0] sm:$0xff] }
 0x23f   :  { %717 = vmatpush1.bf16.msra.mxu1 %v430_v7  ;;  %799 = vmatpush1.bf16.msra.mxu0 %v432_v8  ;;  %v479_v33 = vld [vmem:[#allocation4 + $0x208] sm:$0xff]  ;;  %v481_v35 = vld [vmem:[#allocation4 + $0x218] sm:$0xff]  ;;  %v478_v37 = vld [vmem:[#allocation4 + $0x200] sm:$0xff]  ;;  %v1707_v8 = vpack.c.bf16 %v1695_v54, %v1695_v54 }
 0x240   :  { %718 = vmatprep.subr.bf16.mxu1 %v439_v9  ;;  %800 = vmatprep.subr.bf16.mxu0 %v441_v10  ;;  %v480_v38 = vld [vmem:[#allocation4 + $0x210] sm:$0xff]  ;;  %v487_v39 = vld [vmem:[#allocation4 + $0x248] sm:$0xff]  ;;  %v489_v26 = vld [vmem:[#allocation4 + $0x258] sm:$0xff] }
 0x241   :  { %v486_v40 = vld [vmem:[#allocation4 + $0x240] sm:$0xff]  ;;  %v488_v41 = vld [vmem:[#allocation4 + $0x250] sm:$0xff]  ;;  %v495_v42 = vld [vmem:[#allocation4 + $0x288] sm:$0xff] }
 0x242   :  { %v497_v43 = vld [vmem:[#allocation4 + $0x298] sm:$0xff]  ;;  %v494_v44 = vld [vmem:[#allocation4 + $0x280] sm:$0xff]  ;;  %v496_v45 = vld [vmem:[#allocation4 + $0x290] sm:$0xff] }
 0x243   :  { %719 = vmatpush1.bf16.msra.mxu1 %v438_v11  ;;  %801 = vmatpush1.bf16.msra.mxu0 %v440_v14  ;;  %v503_v46 = vld [vmem:[#allocation4 + $0x2c8] sm:$0xff]  ;;  %v505_v47 = vld [vmem:[#allocation4 + $0x2d8] sm:$0xff]  ;;  %v502_v48 = vld [vmem:[#allocation4 + $0x2c0] sm:$0xff] }
 0x244   :  { %720 = vmatprep.subr.bf16.mxu1 %v447_v16  ;;  %802 = vmatprep.subr.bf16.mxu0 %v449_v17  ;;  %v504_v49 = vld [vmem:[#allocation4 + $0x2d0] sm:$0xff]  ;;  %v511_v50 = vld [vmem:[#allocation4 + $0x308] sm:$0xff]  ;;  %v513_v51 = vld [vmem:[#allocation4 + $0x318] sm:$0xff]  ;;  %v1711_v16 = vpack.c.bf16 %v1699_v59, %v1699_v59 }
 0x245   :  { %v510_v52 = vld [vmem:[#allocation4 + $0x300] sm:$0xff]  ;;  %v512_v53 = vld [vmem:[#allocation4 + $0x310] sm:$0xff]  ;;  %v519_v56 = vld [vmem:[#allocation4 + $0x348] sm:$0xff] }
 0x246   :  { %v521_v57 = vld [vmem:[#allocation4 + $0x358] sm:$0xff]  ;;  %v518_v58 = vld [vmem:[#allocation4 + $0x340] sm:$0xff]  ;;  %v520_v61 = vld [vmem:[#allocation4 + $0x350] sm:$0xff] }
 0x247   :  { %721 = vmatpush1.bf16.msra.mxu1 %v446_v18  ;;  %803 = vmatpush1.bf16.msra.mxu0 %v448_v19  ;;  %v527_v62 = vld [vmem:[#allocation4 + $0x388] sm:$0xff]  ;;  %v529_v63 = vld [vmem:[#allocation4 + $0x398] sm:$0xff]  ;;  %v526_v0 = vld [vmem:[#allocation4 + $0x380] sm:$0xff] }
 0x248   :  { %722 = vmatprep.subr.bf16.mxu1 %v455_v20  ;;  %804 = vmatprep.subr.bf16.mxu0 %v457_v21  ;;  %v528_v1 = vld [vmem:[#allocation4 + $0x390] sm:$0xff]  ;;  %v535_v2 = vld [vmem:[#allocation4 + $0x3c8] sm:$0xff]  ;;  %v537_v3 = vld [vmem:[#allocation4 + $0x3d8] sm:$0xff] }
 0x249   :  { %v534_v4 = vld [vmem:[#allocation4 + $0x3c0] sm:$0xff]  ;;  %v536_v5 = vld [vmem:[#allocation4 + $0x3d0] sm:$0xff]  ;;  %v543_v6 = vld [vmem:[#allocation4 + $0x408] sm:$0xff] }
 0x24a   :  { %v545_v7 = vld [vmem:[#allocation4 + $0x418] sm:$0xff]  ;;  %v542_v9 = vld [vmem:[#allocation4 + $0x400] sm:$0xff]  ;;  %v544_v10 = vld [vmem:[#allocation4 + $0x410] sm:$0xff] }
 0x24b   :  { %723 = vmatpush1.bf16.msra.mxu1 %v454_v22  ;;  %805 = vmatpush1.bf16.msra.mxu0 %v456_v23  ;;  %v551_v11 = vld [vmem:[#allocation4 + $0x448] sm:$0xff]  ;;  %v553_v14 = vld [vmem:[#allocation4 + $0x458] sm:$0xff]  ;;  %v550_v54 = vld [vmem:[#allocation4 + $0x440] sm:$0xff] }
 0x24c   :  { %724 = vmatprep.subr.bf16.mxu1 %v463_v24  ;;  %806 = vmatprep.subr.bf16.mxu0 %v465_v25  ;;  %v552_v17 = vld [vmem:[#allocation4 + $0x450] sm:$0xff]  ;;  %v559_v18 = vld [vmem:[#allocation4 + $0x488] sm:$0xff]  ;;  %v561_v19 = vld [vmem:[#allocation4 + $0x498] sm:$0xff] }
 0x24d   :  { %v558_v59 = vld [vmem:[#allocation4 + $0x480] sm:$0xff]  ;;  %v560_v20 = vld [vmem:[#allocation4 + $0x490] sm:$0xff]  ;;  %v567_v21 = vld [vmem:[#allocation4 + $0x4c8] sm:$0xff] }
 0x24e   :  { %v569_v22 = vld [vmem:[#allocation4 + $0x4d8] sm:$0xff]  ;;  %v566_v23 = vld [vmem:[#allocation4 + $0x4c0] sm:$0xff]  ;;  %v568_v24 = vld [vmem:[#allocation4 + $0x4d0] sm:$0xff] }
 0x24f   :  { %725 = vmatpush1.bf16.msra.mxu1 %v462_v27  ;;  %807 = vmatpush1.bf16.msra.mxu0 %v464_v28  ;;  %v575_v25 = vld [vmem:[#allocation4 + $0x508] sm:$0xff]  ;;  %v577_v27 = vld [vmem:[#allocation4 + $0x518] sm:$0xff]  ;;  %v574_v28 = vld [vmem:[#allocation4 + $0x500] sm:$0xff] }
 0x250   :  { %726 = vmatprep.subr.bf16.mxu1 %v471_v29  ;;  %808 = vmatprep.subr.bf16.mxu0 %v473_v30  ;;  %v576_v29 = vld [vmem:[#allocation4 + $0x510] sm:$0xff]  ;;  %v583_v30 = vld [vmem:[#allocation4 + $0x548] sm:$0xff] }
 0x253   :  { %727 = vmatpush1.bf16.msra.mxu1 %v470_v31  ;;  %809 = vmatpush1.bf16.msra.mxu0 %v472_v32  ;;  %v585_v31 = vld [vmem:[#allocation4 + $0x558] sm:$0xff]  ;;  %v582_v32 = vld [vmem:[#allocation4 + $0x540] sm:$0xff] }
 0x254   :  { %728 = vmatprep.subr.bf16.mxu1 %v479_v33  ;;  %810 = vmatprep.subr.bf16.mxu0 %v481_v35  ;;  %v584_v33 = vld [vmem:[#allocation4 + $0x550] sm:$0xff]  ;;  %v591_v35 = vld [vmem:[#allocation4 + $0x588] sm:$0xff] }
 0x257   :  { %729 = vmatpush1.bf16.msra.mxu1 %v478_v37  ;;  %811 = vmatpush1.bf16.msra.mxu0 %v480_v38  ;;  %v593_v37 = vld [vmem:[#allocation4 + $0x598] sm:$0xff]  ;;  %v590_v38 = vld [vmem:[#allocation4 + $0x580] sm:$0xff] }
 0x258   :  { %730 = vmatprep.subr.bf16.mxu1 %v487_v39  ;;  %812 = vmatprep.subr.bf16.mxu0 %v489_v26  ;;  %v592_v39 = vld [vmem:[#allocation4 + $0x590] sm:$0xff]  ;;  %v599_v26 = vld [vmem:[#allocation4 + $0x5c8] sm:$0xff] }
 0x25b   :  { %731 = vmatpush1.bf16.msra.mxu1 %v486_v40  ;;  %813 = vmatpush1.bf16.msra.mxu0 %v488_v41  ;;  %v601_v40 = vld [vmem:[#allocation4 + $0x5d8] sm:$0xff]  ;;  %v598_v41 = vld [vmem:[#allocation4 + $0x5c0] sm:$0xff] }
 0x25c   :  { %732 = vmatprep.subr.bf16.mxu1 %v495_v42  ;;  %814 = vmatprep.subr.bf16.mxu0 %v497_v43  ;;  %v600_v42 = vld [vmem:[#allocation4 + $0x5d0] sm:$0xff]  ;;  %v607_v43 = vld [vmem:[#allocation4 + $0x608] sm:$0xff] }
 0x25f   :  { %733 = vmatpush1.bf16.msra.mxu1 %v494_v44  ;;  %815 = vmatpush1.bf16.msra.mxu0 %v496_v45  ;;  %v609_v44 = vld [vmem:[#allocation4 + $0x618] sm:$0xff]  ;;  %v606_v45 = vld [vmem:[#allocation4 + $0x600] sm:$0xff] }
 0x260   :  { %734 = vmatprep.subr.bf16.mxu1 %v503_v46  ;;  %816 = vmatprep.subr.bf16.mxu0 %v505_v47  ;;  %v608_v46 = vld [vmem:[#allocation4 + $0x610] sm:$0xff]  ;;  %v615_v47 = vld [vmem:[#allocation4 + $0x648] sm:$0xff] }
 0x263   :  { %735 = vmatpush1.bf16.msra.mxu1 %v502_v48  ;;  %817 = vmatpush1.bf16.msra.mxu0 %v504_v49  ;;  %v617_v48 = vld [vmem:[#allocation4 + $0x658] sm:$0xff]  ;;  %v614_v49 = vld [vmem:[#allocation4 + $0x640] sm:$0xff] }
 0x264   :  { %736 = vmatprep.subr.bf16.mxu1 %v511_v50  ;;  %818 = vmatprep.subr.bf16.mxu0 %v513_v51  ;;  %v616_v50 = vld [vmem:[#allocation4 + $0x650] sm:$0xff]  ;;  %v623_v51 = vld [vmem:[#allocation4 + $0x688] sm:$0xff] }
 0x267   :  { %737 = vmatpush1.bf16.msra.mxu1 %v510_v52  ;;  %819 = vmatpush1.bf16.msra.mxu0 %v512_v53  ;;  %v625_v52 = vld [vmem:[#allocation4 + $0x698] sm:$0xff]  ;;  %v622_v53 = vld [vmem:[#allocation4 + $0x680] sm:$0xff] }
 0x268   :  { %738 = vmatprep.subr.bf16.mxu1 %v519_v56  ;;  %820 = vmatprep.subr.bf16.mxu0 %v521_v57  ;;  %v624_v56 = vld [vmem:[#allocation4 + $0x690] sm:$0xff]  ;;  %v631_v57 = vld [vmem:[#allocation4 + $0x6c8] sm:$0xff] }
 0x26b   :  { %739 = vmatpush1.bf16.msra.mxu1 %v518_v58  ;;  %821 = vmatpush1.bf16.msra.mxu0 %v520_v61  ;;  %v633_v58 = vld [vmem:[#allocation4 + $0x6d8] sm:$0xff]  ;;  %v630_v61 = vld [vmem:[#allocation4 + $0x6c0] sm:$0xff] }
 0x26c   :  { %740 = vmatprep.subr.bf16.mxu1 %v527_v62  ;;  %822 = vmatprep.subr.bf16.mxu0 %v529_v63  ;;  %v632_v62 = vld [vmem:[#allocation4 + $0x6d0] sm:$0xff]  ;;  %v639_v63 = vld [vmem:[#allocation4 + $0x708] sm:$0xff] }
 0x26f   :  { %741 = vmatpush1.bf16.msra.mxu1 %v526_v0  ;;  %823 = vmatpush1.bf16.msra.mxu0 %v528_v1  ;;  %v641_v0 = vld [vmem:[#allocation4 + $0x718] sm:$0xff]  ;;  %v638_v1 = vld [vmem:[#allocation4 + $0x700] sm:$0xff] }
 0x270   :  { %742 = vmatprep.subr.bf16.mxu1 %v535_v2  ;;  %824 = vmatprep.subr.bf16.mxu0 %v537_v3  ;;  %v640_v2 = vld [vmem:[#allocation4 + $0x710] sm:$0xff]  ;;  %v647_v3 = vld [vmem:[#allocation4 + $0x748] sm:$0xff] }
 0x273   :  { %743 = vmatpush1.bf16.msra.mxu1 %v534_v4  ;;  %825 = vmatpush1.bf16.msra.mxu0 %v536_v5  ;;  %v649_v4 = vld [vmem:[#allocation4 + $0x758] sm:$0xff]  ;;  %v646_v5 = vld [vmem:[#allocation4 + $0x740] sm:$0xff] }
 0x274   :  { %753 = vmatprep.subr.bf16.mxu1 %v543_v6  ;;  %835 = vmatprep.subr.bf16.mxu0 %v545_v7  ;;  %v648_v6 = vld [vmem:[#allocation4 + $0x750] sm:$0xff]  ;;  %v655_v7 = vld [vmem:[#allocation4 + $0x788] sm:$0xff] }
 0x276   :  { %745 = vmatmul.mubr.bf16.vlgmr.msra.gmra.mrb[4].mxu1 %v1707_v8  ;;  %827 = vmatmul.mubr.bf16.vlgmr.msra.gmra.mrb[8].mxu0 %v1707_v8 }
 0x277   :  { %754 = vmatpush1.bf16.msra.mxu1 %v542_v9  ;;  %836 = vmatpush1.bf16.msra.mxu0 %v544_v10  ;;  %v657_v9 = vld [vmem:[#allocation4 + $0x798] sm:$0xff]  ;;  %v654_v10 = vld [vmem:[#allocation4 + $0x780] sm:$0xff] }
 0x278   :  { %755 = vmatprep.subr.bf16.mxu1 %v551_v11  ;;  %837 = vmatprep.subr.bf16.mxu0 %v553_v14  ;;  %v656_v11 = vld [vmem:[#allocation4 + $0x790] sm:$0xff]  ;;  %v663_v14 = vld [vmem:[#allocation4 + $0x7c8] sm:$0xff] }
 0x279   :  { %785 = vmatprep.mubr.bf16.mxu1 %v1711_v16  ;;  %867 = vmatprep.mubr.bf16.mxu0 %v1711_v16 }
 0x27b   :  { %756 = vmatpush1.bf16.msra.mxu1 %v550_v54  ;;  %838 = vmatpush1.bf16.msra.mxu0 %v552_v17  ;;  %v665_v54 = vld [vmem:[#allocation4 + $0x7d8] sm:$0xff]  ;;  %v662_v17 = vld [vmem:[#allocation4 + $0x7c0] sm:$0xff] }
 0x27c   :  { %757 = vmatprep.subr.bf16.mxu1 %v559_v18  ;;  %839 = vmatprep.subr.bf16.mxu0 %v561_v19  ;;  %v664_v18 = vld [vmem:[#allocation4 + $0x7d0] sm:$0xff]  ;;  %v419_v19 = vld [vmem:[#allocation4 + $0x28] sm:$0xff] }
 0x27f   :  { %758 = vmatpush1.bf16.msra.mxu1 %v558_v59  ;;  %840 = vmatpush1.bf16.msra.mxu0 %v560_v20  ;;  %v421_v59 = vld [vmem:[#allocation4 + $0x38] sm:$0xff]  ;;  %v1719_v20 = vpack.c.bf16 %v1697_v55, %v1697_v55  ;;  %v435_v55 = vld [vmem:[#allocation4 + $0xa8] sm:$0xff] }
 0x280   :  { %759 = vmatprep.subr.bf16.mxu1 %v567_v21  ;;  %841 = vmatprep.subr.bf16.mxu0 %v569_v22  ;;  %v418_v21 = vld [vmem:[#allocation4 + $0x20] sm:$0xff]  ;;  %v420_v22 = vld [vmem:[#allocation4 + $0x30] sm:$0xff] }
 0x283   :  { %760 = vmatpush1.bf16.msra.mxu1 %v566_v23  ;;  %842 = vmatpush1.bf16.msra.mxu0 %v568_v24  ;;  %v427_v23 = vld [vmem:[#allocation4 + $0x68] sm:$0xff]  ;;  %v429_v24 = vld [vmem:[#allocation4 + $0x78] sm:$0xff] }
 0x284   :  { %761 = vmatprep.subr.bf16.mxu1 %v575_v25  ;;  %843 = vmatprep.subr.bf16.mxu0 %v577_v27  ;;  %v426_v25 = vld [vmem:[#allocation4 + $0x60] sm:$0xff]  ;;  %v428_v27 = vld [vmem:[#allocation4 + $0x70] sm:$0xff] }
 0x287   :  { %762 = vmatpush1.bf16.msra.mxu1 %v574_v28  ;;  %844 = vmatpush1.bf16.msra.mxu0 %v576_v29  ;;  %v437_v28 = vld [vmem:[#allocation4 + $0xb8] sm:$0xff]  ;;  %v434_v29 = vld [vmem:[#allocation4 + $0xa0] sm:$0xff] }
 0x288   :  { %763 = vmatprep.subr.bf16.mxu1 %v583_v30  ;;  %845 = vmatprep.subr.bf16.mxu0 %v585_v31  ;;  %v436_v30 = vld [vmem:[#allocation4 + $0xb0] sm:$0xff]  ;;  %v443_v31 = vld [vmem:[#allocation4 + $0xe8] sm:$0xff] }
 0x28b   :  { %764 = vmatpush1.bf16.msra.mxu1 %v582_v32  ;;  %846 = vmatpush1.bf16.msra.mxu0 %v584_v33  ;;  %v445_v32 = vld [vmem:[#allocation4 + $0xf8] sm:$0xff]  ;;  %v442_v33 = vld [vmem:[#allocation4 + $0xe0] sm:$0xff] }
 0x28c   :  { %765 = vmatprep.subr.bf16.mxu1 %v591_v35  ;;  %847 = vmatprep.subr.bf16.mxu0 %v593_v37  ;;  %v444_v35 = vld [vmem:[#allocation4 + $0xf0] sm:$0xff]  ;;  %v451_v37 = vld [vmem:[#allocation4 + $0x128] sm:$0xff] }
 0x28f   :  { %766 = vmatpush1.bf16.msra.mxu1 %v590_v38  ;;  %848 = vmatpush1.bf16.msra.mxu0 %v592_v39  ;;  %v453_v38 = vld [vmem:[#allocation4 + $0x138] sm:$0xff]  ;;  %v452_v39 = vld [vmem:[#allocation4 + $0x130] sm:$0xff] }
 0x290   :  { %767 = vmatprep.subr.bf16.mxu1 %v599_v26  ;;  %849 = vmatprep.subr.bf16.mxu0 %v601_v40  ;;  %v459_v26 = vld [vmem:[#allocation4 + $0x168] sm:$0xff]  ;;  %v461_v40 = vld [vmem:[#allocation4 + $0x178] sm:$0xff] }
 0x293   :  { %768 = vmatpush1.bf16.msra.mxu1 %v598_v41  ;;  %850 = vmatpush1.bf16.msra.mxu0 %v600_v42  ;;  %v458_v41 = vld [vmem:[#allocation4 + $0x160] sm:$0xff]  ;;  %v460_v42 = vld [vmem:[#allocation4 + $0x170] sm:$0xff] }
 0x294   :  { %769 = vmatprep.subr.bf16.mxu1 %v607_v43  ;;  %851 = vmatprep.subr.bf16.mxu0 %v609_v44  ;;  %v467_v43 = vld [vmem:[#allocation4 + $0x1a8] sm:$0xff]  ;;  %v469_v44 = vld [vmem:[#allocation4 + $0x1b8] sm:$0xff] }
 0x297   :  { %770 = vmatpush1.bf16.msra.mxu1 %v606_v45  ;;  %852 = vmatpush1.bf16.msra.mxu0 %v608_v46  ;;  %v466_v45 = vld [vmem:[#allocation4 + $0x1a0] sm:$0xff]  ;;  %v468_v46 = vld [vmem:[#allocation4 + $0x1b0] sm:$0xff] }
 0x298   :  { %771 = vmatprep.subr.bf16.mxu1 %v615_v47  ;;  %853 = vmatprep.subr.bf16.mxu0 %v617_v48  ;;  %v475_v47 = vld [vmem:[#allocation4 + $0x1e8] sm:$0xff]  ;;  %v477_v48 = vld [vmem:[#allocation4 + $0x1f8] sm:$0xff] }
 0x29b   :  { %772 = vmatpush1.bf16.msra.mxu1 %v614_v49  ;;  %854 = vmatpush1.bf16.msra.mxu0 %v616_v50  ;;  %v474_v49 = vld [vmem:[#allocation4 + $0x1e0] sm:$0xff]  ;;  %v476_v50 = vld [vmem:[#allocation4 + $0x1f0] sm:$0xff] }
 0x29c   :  { %773 = vmatprep.subr.bf16.mxu1 %v623_v51  ;;  %855 = vmatprep.subr.bf16.mxu0 %v625_v52  ;;  %v483_v51 = vld [vmem:[#allocation4 + $0x228] sm:$0xff]  ;;  %v485_v52 = vld [vmem:[#allocation4 + $0x238] sm:$0xff] }
 0x29f   :  { %774 = vmatpush1.bf16.msra.mxu1 %v622_v53  ;;  %856 = vmatpush1.bf16.msra.mxu0 %v624_v56  ;;  %v482_v53 = vld [vmem:[#allocation4 + $0x220] sm:$0xff]  ;;  %v484_v56 = vld [vmem:[#allocation4 + $0x230] sm:$0xff] }
 0x2a0   :  { %775 = vmatprep.subr.bf16.mxu1 %v631_v57  ;;  %857 = vmatprep.subr.bf16.mxu0 %v633_v58  ;;  %v491_v57 = vld [vmem:[#allocation4 + $0x268] sm:$0xff]  ;;  %v493_v58 = vld [vmem:[#allocation4 + $0x278] sm:$0xff] }
 0x2a3   :  { %776 = vmatpush1.bf16.msra.mxu1 %v630_v61  ;;  %858 = vmatpush1.bf16.msra.mxu0 %v632_v62  ;;  %v490_v61 = vld [vmem:[#allocation4 + $0x260] sm:$0xff]  ;;  %v492_v62 = vld [vmem:[#allocation4 + $0x270] sm:$0xff] }
 0x2a4   :  { %777 = vmatprep.subr.bf16.mxu1 %v639_v63  ;;  %859 = vmatprep.subr.bf16.mxu0 %v641_v0  ;;  %v499_v63 = vld [vmem:[#allocation4 + $0x2a8] sm:$0xff]  ;;  %v501_v0 = vld [vmem:[#allocation4 + $0x2b8] sm:$0xff] }
 0x2a7   :  { %778 = vmatpush1.bf16.msra.mxu1 %v638_v1  ;;  %860 = vmatpush1.bf16.msra.mxu0 %v640_v2  ;;  %v498_v1 = vld [vmem:[#allocation4 + $0x2a0] sm:$0xff]  ;;  %v500_v2 = vld [vmem:[#allocation4 + $0x2b0] sm:$0xff] }
 0x2a8   :  { %779 = vmatprep.subr.bf16.mxu1 %v647_v3  ;;  %861 = vmatprep.subr.bf16.mxu0 %v649_v4  ;;  %v507_v3 = vld [vmem:[#allocation4 + $0x2e8] sm:$0xff]  ;;  %v509_v4 = vld [vmem:[#allocation4 + $0x2f8] sm:$0xff] }
 0x2ab   :  { %780 = vmatpush1.bf16.msra.mxu1 %v646_v5  ;;  %862 = vmatpush1.bf16.msra.mxu0 %v648_v6  ;;  %v506_v5 = vld [vmem:[#allocation4 + $0x2e0] sm:$0xff]  ;;  %v508_v6 = vld [vmem:[#allocation4 + $0x2f0] sm:$0xff] }
 0x2ac   :  { %781 = vmatprep.subr.bf16.mxu1 %v655_v7  ;;  %863 = vmatprep.subr.bf16.mxu0 %v657_v9  ;;  %v515_v7 = vld [vmem:[#allocation4 + $0x328] sm:$0xff]  ;;  %v517_v9 = vld [vmem:[#allocation4 + $0x338] sm:$0xff] }
 0x2af   :  { %782 = vmatpush1.bf16.msra.mxu1 %v654_v10  ;;  %864 = vmatpush1.bf16.msra.mxu0 %v656_v11  ;;  %v514_v10 = vld [vmem:[#allocation4 + $0x320] sm:$0xff]  ;;  %v516_v11 = vld [vmem:[#allocation4 + $0x330] sm:$0xff] }
 0x2b0   :  { %783 = vmatprep.subr.bf16.mxu1 %v663_v14  ;;  %865 = vmatprep.subr.bf16.mxu0 %v665_v54  ;;  %v523_v14 = vld [vmem:[#allocation4 + $0x368] sm:$0xff]  ;;  %v525_v54 = vld [vmem:[#allocation4 + $0x378] sm:$0xff] }
 0x2b3   :  { %784 = vmatpush1.bf16.msra.mxu1 %v662_v17  ;;  %866 = vmatpush1.bf16.msra.mxu0 %v664_v18  ;;  %v522_v17 = vld [vmem:[#allocation4 + $0x360] sm:$0xff]  ;;  %v524_v18 = vld [vmem:[#allocation4 + $0x370] sm:$0xff] }
 0x2b4   :  { %876 = vmatprep.subr.bf16.mxu1 %v419_v19  ;;  %958 = vmatprep.subr.bf16.mxu0 %v421_v59  ;;  %v531_v19 = vld [vmem:[#allocation4 + $0x3a8] sm:$0xff]  ;;  %v533_v59 = vld [vmem:[#allocation4 + $0x3b8] sm:$0xff] }
 0x2b6   :  { %786 = vmatmul.mubr.bf16.vlgmr.msra.gmra.mrb[4].mxu1 %v1719_v20  ;;  %868 = vmatmul.mubr.bf16.vlgmr.msra.gmra.mrb[8].mxu0 %v1719_v20 }
 0x2b7   :  { %877 = vmatpush1.bf16.msra.mxu1 %v418_v21  ;;  %959 = vmatpush1.bf16.msra.mxu0 %v420_v22  ;;  %v530_v21 = vld [vmem:[#allocation4 + $0x3a0] sm:$0xff]  ;;  %v532_v22 = vld [vmem:[#allocation4 + $0x3b0] sm:$0xff] }
 0x2b8   :  { %878 = vmatprep.subr.bf16.mxu1 %v427_v23  ;;  %960 = vmatprep.subr.bf16.mxu0 %v429_v24  ;;  %v539_v23 = vld [vmem:[#allocation4 + $0x3e8] sm:$0xff]  ;;  %v541_v24 = vld [vmem:[#allocation4 + $0x3f8] sm:$0xff] }
 0x2b9   :  { %908 = vmatprep.mubr.bf16.mxu1 %v1701_v60  ;;  %990 = vmatprep.mubr.bf16.mxu0 %v1701_v60  ;;  %v450_v60 = vld [vmem:[#allocation4 + $0x120] sm:$0xff] }
 0x2bb   :  { %879 = vmatpush1.bf16.msra.mxu1 %v426_v25  ;;  %961 = vmatpush1.bf16.msra.mxu0 %v428_v27  ;;  %v538_v25 = vld [vmem:[#allocation4 + $0x3e0] sm:$0xff]  ;;  %v540_v27 = vld [vmem:[#allocation4 + $0x3f0] sm:$0xff] }
 0x2bc   :  { %880 = vmatprep.subr.bf16.mxu1 %v435_v55  ;;  %962 = vmatprep.subr.bf16.mxu0 %v437_v28  ;;  %v547_v55 = vld [vmem:[#allocation4 + $0x428] sm:$0xff]  ;;  %v549_v28 = vld [vmem:[#allocation4 + $0x438] sm:$0xff] }
 0x2bf   :  { %881 = vmatpush1.bf16.msra.mxu1 %v434_v29  ;;  %963 = vmatpush1.bf16.msra.mxu0 %v436_v30  ;;  %v546_v29 = vld [vmem:[#allocation4 + $0x420] sm:$0xff]  ;;  %v548_v30 = vld [vmem:[#allocation4 + $0x430] sm:$0xff] }
 0x2c0   :  { %882 = vmatprep.subr.bf16.mxu1 %v443_v31  ;;  %964 = vmatprep.subr.bf16.mxu0 %v445_v32  ;;  %v555_v31 = vld [vmem:[#allocation4 + $0x468] sm:$0xff]  ;;  %v557_v32 = vld [vmem:[#allocation4 + $0x478] sm:$0xff] }
 0x2c3   :  { %883 = vmatpush1.bf16.msra.mxu1 %v442_v33  ;;  %965 = vmatpush1.bf16.msra.mxu0 %v444_v35  ;;  %v554_v33 = vld [vmem:[#allocation4 + $0x460] sm:$0xff]  ;;  %v556_v35 = vld [vmem:[#allocation4 + $0x470] sm:$0xff] }
 0x2c4   :  { %884 = vmatprep.subr.bf16.mxu1 %v451_v37  ;;  %966 = vmatprep.subr.bf16.mxu0 %v453_v38  ;;  %v563_v37 = vld [vmem:[#allocation4 + $0x4a8] sm:$0xff]  ;;  %v565_v38 = vld [vmem:[#allocation4 + $0x4b8] sm:$0xff] }
 0x2c7   :  { %885 = vmatpush1.bf16.msra.mxu1 %v450_v60  ;;  %967 = vmatpush1.bf16.msra.mxu0 %v452_v39  ;;  %v562_v60 = vld [vmem:[#allocation4 + $0x4a0] sm:$0xff]  ;;  %v564_v39 = vld [vmem:[#allocation4 + $0x4b0] sm:$0xff] }
 0x2c8   :  { %886 = vmatprep.subr.bf16.mxu1 %v459_v26  ;;  %968 = vmatprep.subr.bf16.mxu0 %v461_v40  ;;  %v571_v26 = vld [vmem:[#allocation4 + $0x4e8] sm:$0xff]  ;;  %v570_v40 = vld [vmem:[#allocation4 + $0x4e0] sm:$0xff] }
 0x2cb   :  { %887 = vmatpush1.bf16.msra.mxu1 %v458_v41  ;;  %969 = vmatpush1.bf16.msra.mxu0 %v460_v42  ;;  %v572_v41 = vld [vmem:[#allocation4 + $0x4f0] sm:$0xff]  ;;  %v579_v42 = vld [vmem:[#allocation4 + $0x528] sm:$0xff] }
 0x2cc   :  { %888 = vmatprep.subr.bf16.mxu1 %v467_v43  ;;  %970 = vmatprep.subr.bf16.mxu0 %v469_v44  ;;  %v581_v43 = vld [vmem:[#allocation4 + $0x538] sm:$0xff]  ;;  %v580_v44 = vld [vmem:[#allocation4 + $0x530] sm:$0xff] }
 0x2cf   :  { %889 = vmatpush1.bf16.msra.mxu1 %v466_v45  ;;  %971 = vmatpush1.bf16.msra.mxu0 %v468_v46  ;;  %v587_v45 = vld [vmem:[#allocation4 + $0x568] sm:$0xff]  ;;  %v589_v46 = vld [vmem:[#allocation4 + $0x578] sm:$0xff] }
 0x2d0   :  { %890 = vmatprep.subr.bf16.mxu1 %v475_v47  ;;  %972 = vmatprep.subr.bf16.mxu0 %v477_v48  ;;  %v586_v47 = vld [vmem:[#allocation4 + $0x560] sm:$0xff]  ;;  %v588_v48 = vld [vmem:[#allocation4 + $0x570] sm:$0xff] }
 0x2d3   :  { %891 = vmatpush1.bf16.msra.mxu1 %v474_v49  ;;  %973 = vmatpush1.bf16.msra.mxu0 %v476_v50  ;;  %v595_v49 = vld [vmem:[#allocation4 + $0x5a8] sm:$0xff]  ;;  %v597_v50 = vld [vmem:[#allocation4 + $0x5b8] sm:$0xff] }
 0x2d4   :  { %892 = vmatprep.subr.bf16.mxu1 %v483_v51  ;;  %974 = vmatprep.subr.bf16.mxu0 %v485_v52  ;;  %v594_v51 = vld [vmem:[#allocation4 + $0x5a0] sm:$0xff]  ;;  %v596_v52 = vld [vmem:[#allocation4 + $0x5b0] sm:$0xff] }
 0x2d7   :  { %893 = vmatpush1.bf16.msra.mxu1 %v482_v53  ;;  %975 = vmatpush1.bf16.msra.mxu0 %v484_v56  ;;  %v603_v53 = vld [vmem:[#allocation4 + $0x5e8] sm:$0xff]  ;;  %v605_v56 = vld [vmem:[#allocation4 + $0x5f8] sm:$0xff] }
 0x2d8   :  { %894 = vmatprep.subr.bf16.mxu1 %v491_v57  ;;  %976 = vmatprep.subr.bf16.mxu0 %v493_v58  ;;  %v602_v57 = vld [vmem:[#allocation4 + $0x5e0] sm:$0xff]  ;;  %v604_v58 = vld [vmem:[#allocation4 + $0x5f0] sm:$0xff] }
 0x2db   :  { %895 = vmatpush1.bf16.msra.mxu1 %v490_v61  ;;  %977 = vmatpush1.bf16.msra.mxu0 %v492_v62  ;;  %v611_v61 = vld [vmem:[#allocation4 + $0x628] sm:$0xff]  ;;  %v613_v62 = vld [vmem:[#allocation4 + $0x638] sm:$0xff] }
 0x2dc   :  { %896 = vmatprep.subr.bf16.mxu1 %v499_v63  ;;  %978 = vmatprep.subr.bf16.mxu0 %v501_v0  ;;  %v610_v63 = vld [vmem:[#allocation4 + $0x620] sm:$0xff]  ;;  %v612_v0 = vld [vmem:[#allocation4 + $0x630] sm:$0xff] }
 0x2df   :  { %897 = vmatpush1.bf16.msra.mxu1 %v498_v1  ;;  %979 = vmatpush1.bf16.msra.mxu0 %v500_v2  ;;  %v619_v1 = vld [vmem:[#allocation4 + $0x668] sm:$0xff]  ;;  %v621_v2 = vld [vmem:[#allocation4 + $0x678] sm:$0xff] }
 0x2e0   :  { %898 = vmatprep.subr.bf16.mxu1 %v507_v3  ;;  %980 = vmatprep.subr.bf16.mxu0 %v509_v4  ;;  %v618_v3 = vld [vmem:[#allocation4 + $0x660] sm:$0xff]  ;;  %v620_v4 = vld [vmem:[#allocation4 + $0x670] sm:$0xff] }
 0x2e3   :  { %899 = vmatpush1.bf16.msra.mxu1 %v506_v5  ;;  %981 = vmatpush1.bf16.msra.mxu0 %v508_v6  ;;  %v627_v5 = vld [vmem:[#allocation4 + $0x6a8] sm:$0xff]  ;;  %v629_v6 = vld [vmem:[#allocation4 + $0x6b8] sm:$0xff] }
 0x2e4   :  { %900 = vmatprep.subr.bf16.mxu1 %v515_v7  ;;  %982 = vmatprep.subr.bf16.mxu0 %v517_v9  ;;  %v626_v7 = vld [vmem:[#allocation4 + $0x6a0] sm:$0xff]  ;;  %v628_v9 = vld [vmem:[#allocation4 + $0x6b0] sm:$0xff] }
 0x2e7   :  { %901 = vmatpush1.bf16.msra.mxu1 %v514_v10  ;;  %983 = vmatpush1.bf16.msra.mxu0 %v516_v11  ;;  %v635_v10 = vld [vmem:[#allocation4 + $0x6e8] sm:$0xff]  ;;  %v637_v11 = vld [vmem:[#allocation4 + $0x6f8] sm:$0xff] }
 0x2e8   :  { %902 = vmatprep.subr.bf16.mxu1 %v523_v14  ;;  %984 = vmatprep.subr.bf16.mxu0 %v525_v54  ;;  %v634_v14 = vld [vmem:[#allocation4 + $0x6e0] sm:$0xff]  ;;  %v636_v54 = vld [vmem:[#allocation4 + $0x6f0] sm:$0xff] }
 0x2eb   :  { %903 = vmatpush1.bf16.msra.mxu1 %v522_v17  ;;  %985 = vmatpush1.bf16.msra.mxu0 %v524_v18  ;;  %v643_v17 = vld [vmem:[#allocation4 + $0x728] sm:$0xff]  ;;  %v645_v18 = vld [vmem:[#allocation4 + $0x738] sm:$0xff] }
 0x2ec   :  { %904 = vmatprep.subr.bf16.mxu1 %v531_v19  ;;  %986 = vmatprep.subr.bf16.mxu0 %v533_v59  ;;  %v642_v19 = vld [vmem:[#allocation4 + $0x720] sm:$0xff]  ;;  %v644_v59 = vld [vmem:[#allocation4 + $0x730] sm:$0xff] }
 0x2ef   :  { %905 = vmatpush1.bf16.msra.mxu1 %v530_v21  ;;  %987 = vmatpush1.bf16.msra.mxu0 %v532_v22  ;;  %v651_v21 = vld [vmem:[#allocation4 + $0x768] sm:$0xff]  ;;  %v653_v22 = vld [vmem:[#allocation4 + $0x778] sm:$0xff] }
 0x2f0   :  { %906 = vmatprep.subr.bf16.mxu1 %v539_v23  ;;  %988 = vmatprep.subr.bf16.mxu0 %v541_v24  ;;  %v650_v23 = vld [vmem:[#allocation4 + $0x760] sm:$0xff]  ;;  %v652_v24 = vld [vmem:[#allocation4 + $0x770] sm:$0xff] }
 0x2f3   :  { %907 = vmatpush1.bf16.msra.mxu1 %v538_v25  ;;  %989 = vmatpush1.bf16.msra.mxu0 %v540_v27  ;;  %v659_v25 = vld [vmem:[#allocation4 + $0x7a8] sm:$0xff]  ;;  %v661_v27 = vld [vmem:[#allocation4 + $0x7b8] sm:$0xff] }
 0x2f4   :  { %917 = vmatprep.subr.bf16.mxu1 %v547_v55  ;;  %999 = vmatprep.subr.bf16.mxu0 %v549_v28  ;;  %v658_v55 = vld [vmem:[#allocation4 + $0x7a0] sm:$0xff]  ;;  %v660_v28 = vld [vmem:[#allocation4 + $0x7b0] sm:$0xff] }
 0x2f6   :  { %909 = vmatmul.mubr.bf16.vlgmr.msra.gmra.mrb[8].mxu1 %v1707_v8  ;;  %991 = vmatmul.mubr.bf16.vlgmr.msra.gmra.mrb[12].mxu0 %v1707_v8  ;;  %v573_v8 = vld [vmem:[#allocation4 + $0x4f8] sm:$0xff] }
 0x2f7   :  { %918 = vmatpush1.bf16.msra.mxu1 %v546_v29  ;;  %1000 = vmatpush1.bf16.msra.mxu0 %v548_v30  ;;  %v667_v29 = vld [vmem:[#allocation4 + $0x7e8] sm:$0xff]  ;;  %v669_v30 = vld [vmem:[#allocation4 + $0x7f8] sm:$0xff] }
 0x2f8   :  { %919 = vmatprep.subr.bf16.mxu1 %v555_v31  ;;  %1001 = vmatprep.subr.bf16.mxu0 %v557_v32  ;;  %v666_v31 = vld [vmem:[#allocation4 + $0x7e0] sm:$0xff]  ;;  %v668_v32 = vld [vmem:[#allocation4 + $0x7f0] sm:$0xff] }
 0x2f9   :  { %949 = vmatprep.mubr.bf16.mxu1 %v1711_v16  ;;  %1031 = vmatprep.mubr.bf16.mxu0 %v1711_v16  ;;  %v578_v16 = vld [vmem:[#allocation4 + $0x520] sm:$0xff] }
 0x2fb   :  { %920 = vmatpush1.bf16.msra.mxu1 %v554_v33  ;;  %1002 = vmatpush1.bf16.msra.mxu0 %v556_v35  ;;  %v670_v33 = vld [vmem:[%s1790_s7] sm:$0xff] }
 0x2fc   :  { %921 = vmatprep.subr.bf16.mxu1 %v563_v37  ;;  %1003 = vmatprep.subr.bf16.mxu0 %v565_v38  ;;  %v675_v35 = vrot.slane %v670_v33, %v1670_v13  ;;  %v683_v37 = vrot.slane %v670_v33, %v302_v34  ;;  %v679_v38 = vrot.slane %v670_v33, %v1676_v15 }
 0x2ff   :  { %922 = vmatpush1.bf16.msra.mxu1 %v562_v60  ;;  %1004 = vmatpush1.bf16.msra.mxu0 %v564_v39  ;;  %v687_v60 = vrot.slane %v670_v33, %v306_v36 }
 0x300   :  { %923 = vmatprep.subr.bf16.mxu1 %v571_v26  ;;  %1005 = vmatprep.subr.bf16.mxu0 %v573_v8 }
 0x303   :  { %924 = vmatpush1.bf16.msra.mxu1 %v570_v40  ;;  %1006 = vmatpush1.bf16.msra.mxu0 %v572_v41 }
 0x304   :  { %925 = vmatprep.subr.bf16.mxu1 %v579_v42  ;;  %1007 = vmatprep.subr.bf16.mxu0 %v581_v43 }
 0x307   :  { %926 = vmatpush1.bf16.msra.mxu1 %v578_v16  ;;  %1008 = vmatpush1.bf16.msra.mxu0 %v580_v44 }
 0x308   :  { %927 = vmatprep.subr.bf16.mxu1 %v587_v45  ;;  %1009 = vmatprep.subr.bf16.mxu0 %v589_v46 }
 0x30b   :  { %928 = vmatpush1.bf16.msra.mxu1 %v586_v47  ;;  %1010 = vmatpush1.bf16.msra.mxu0 %v588_v48 }
 0x30c   :  { %929 = vmatprep.subr.bf16.mxu1 %v595_v49  ;;  %1011 = vmatprep.subr.bf16.mxu0 %v597_v50 }
 0x30f   :  { %930 = vmatpush1.bf16.msra.mxu1 %v594_v51  ;;  %1012 = vmatpush1.bf16.msra.mxu0 %v596_v52  ;;  %v690_v51 = vsub.s32 4, %v1667_v12  ;;  %v698_v52 = vsub.s32 6, %v1667_v12 }
 0x310   :  { %931 = vmatprep.subr.bf16.mxu1 %v603_v53  ;;  %1013 = vmatprep.subr.bf16.mxu0 %v605_v56  ;;  %v694_v53 = vsub.s32 5, %v1667_v12  ;;  %v702_v56 = vsub.s32 7, %v1667_v12 }
 0x313   :  { %932 = vmatpush1.bf16.msra.mxu1 %v602_v57  ;;  %1014 = vmatpush1.bf16.msra.mxu0 %v604_v58  ;;  %v691_v57 = vrot.slane %v670_v33, %v690_v51  ;;  %v699_v58 = vrot.slane %v670_v33, %v698_v52 }
 0x314   :  { %933 = vmatprep.subr.bf16.mxu1 %v611_v61  ;;  %1015 = vmatprep.subr.bf16.mxu0 %v613_v62  ;;  %v695_v61 = vrot.slane %v670_v33, %v694_v53  ;;  %v703_v62 = vrot.slane %v670_v33, %v702_v56 }
 0x317   :  { %934 = vmatpush1.bf16.msra.mxu1 %v610_v63  ;;  %1016 = vmatpush1.bf16.msra.mxu0 %v612_v0 }
 0x318   :  { %935 = vmatprep.subr.bf16.mxu1 %v619_v1  ;;  %1017 = vmatprep.subr.bf16.mxu0 %v621_v2 }
 0x31b   :  { %936 = vmatpush1.bf16.msra.mxu1 %v618_v3  ;;  %1018 = vmatpush1.bf16.msra.mxu0 %v620_v4 }
 0x31c   :  { %937 = vmatprep.subr.bf16.mxu1 %v627_v5  ;;  %1019 = vmatprep.subr.bf16.mxu0 %v629_v6 }
 0x31f   :  { %938 = vmatpush1.bf16.msra.mxu1 %v626_v7  ;;  %1020 = vmatpush1.bf16.msra.mxu0 %v628_v9 }
 0x320   :  { %939 = vmatprep.subr.bf16.mxu1 %v635_v10  ;;  %1021 = vmatprep.subr.bf16.mxu0 %v637_v11 }
 0x323   :  { %940 = vmatpush1.bf16.msra.mxu1 %v634_v14  ;;  %1022 = vmatpush1.bf16.msra.mxu0 %v636_v54 }
 0x324   :  { %941 = vmatprep.subr.bf16.mxu1 %v643_v17  ;;  %1023 = vmatprep.subr.bf16.mxu0 %v645_v18 }
 0x327   :  { %942 = vmatpush1.bf16.msra.mxu1 %v642_v19  ;;  %1024 = vmatpush1.bf16.msra.mxu0 %v644_v59 }
 0x328   :  { %943 = vmatprep.subr.bf16.mxu1 %v651_v21  ;;  %1025 = vmatprep.subr.bf16.mxu0 %v653_v22 }
 0x32b   :  { %944 = vmatpush1.bf16.msra.mxu1 %v650_v23  ;;  %1026 = vmatpush1.bf16.msra.mxu0 %v652_v24 }
 0x32c   :  { %945 = vmatprep.subr.bf16.mxu1 %v659_v25  ;;  %1027 = vmatprep.subr.bf16.mxu0 %v661_v27 }
 0x32f   :  { %946 = vmatpush1.bf16.msra.mxu1 %v658_v55  ;;  %1028 = vmatpush1.bf16.msra.mxu0 %v660_v28 }
 0x330   :  { %947 = vmatprep.subr.bf16.mxu1 %v667_v29  ;;  %1029 = vmatprep.subr.bf16.mxu0 %v669_v30 }
 0x333   :  { %948 = vmatpush1.bf16.msra.mxu1 %v666_v31  ;;  %1030 = vmatpush1.bf16.msra.mxu0 %v668_v32 }
 0x336   :  { %950 = vmatmul.mubr.bf16.vlgmr.msra.gmra.mrb[8].mxu1 %v1719_v20  ;;  %1032 = vmatmul.mubr.bf16.vlgmr.msra.gmra.mrb[12].mxu0 %v1719_v20 }
 0x389   :  { %v787_v39 = vpop.f32.mrb[4].mxu1  ;;  %v869_v26 = vpop.f32.mrb[8].mxu0 }
 0x38a   :  { %v1450_v8 = vadd.f32 %v787_v39, %v675_v35  ;;  %v1452_v40 = vadd.f32 %v869_v26, %v683_v37  ;;  %v789_v41 = vpop.f32.mrb[5].mxu1  ;;  %v871_v20 = vpop.f32.mrb[9].mxu0 }
 0x38b   :  { %v1451_v42 = vadd.f32 %v789_v41, %v679_v38  ;;  %v1453_v43 = vadd.f32 %v871_v20, %v687_v60  ;;  %v791_v16 = vpop.f32.mrb[6].mxu1  ;;  %v873_v44 = vpop.f32.mrb[10].mxu0 }
 0x38c   :  { %vm1040_vm7 = vcmp.ge.f32.partialorder %v1450_v8, 0.0  ;;  %v1048_v13 = vmul.f32 0.2, %v1450_v8  ;;  %vm1042_vm8 = vcmp.ge.f32.partialorder %v1452_v40, 0.0  ;;  %v1050_v45 = vmul.f32 0.2, %v1452_v40 }
 0x38d   :  { %vm1041_vm9 = vcmp.ge.f32.partialorder %v1451_v42, 0.0  ;;  %v1049_v34 = vmul.f32 0.2, %v1451_v42  ;;  %vm1043_vm10 = vcmp.ge.f32.partialorder %v1453_v43, 0.0  ;;  %v1051_v15 = vmul.f32 0.2, %v1453_v43 }
 0x38e   :  { %v1740_v46 = vsel %vm1040_vm7, %v1450_v8, %v1048_v13  ;;  %v1742_v36 = vsel %vm1042_vm8, %v1452_v40, %v1050_v45  ;;  %v792_v47 = vpop.f32.mrb[7].mxu1  ;;  %v874_v48 = vpop.f32.mrb[11].mxu0 }
 0x38f   :  { %v1057_v49 = vsel %vm1041_vm9, %v1451_v42, %v1049_v34  ;;  %v1059_v50 = vsel %vm1043_vm10, %v1453_v43, %v1051_v15 }
 0x409   :  { %v951_v63 = vpop.f32.mrb[8].mxu1  ;;  %v1033_v0 = vpop.f32.mrb[12].mxu0 }
 0x40a   :  { %v1454_v1 = vadd.f32 %v951_v63, %v691_v57  ;;  %v1456_v2 = vadd.f32 %v1033_v0, %v699_v58  ;;  %v953_v3 = vpop.f32.mrb[9].mxu1  ;;  %v1035_v4 = vpop.f32.mrb[13].mxu0 }
 0x40b   :  { %v1455_v5 = vadd.f32 %v953_v3, %v695_v61  ;;  %v1457_v6 = vadd.f32 %v1035_v4, %v703_v62  ;;  %v955_v7 = vpop.f32.mrb[10].mxu1  ;;  %v1037_v9 = vpop.f32.mrb[14].mxu0 }
 0x40c   :  { %vm1044_vm11 = vcmp.ge.f32.partialorder %v1454_v1, 0.0  ;;  %v1052_v10 = vmul.f32 0.2, %v1454_v1  ;;  %vm1046_vm12 = vcmp.ge.f32.partialorder %v1456_v2, 0.0  ;;  %v1054_v11 = vmul.f32 0.2, %v1456_v2 }
 0x40d   :  { %vm1045_vm13 = vcmp.ge.f32.partialorder %v1455_v5, 0.0  ;;  %v1053_v12 = vmul.f32 0.2, %v1455_v5  ;;  %vm1047_vm14 = vcmp.ge.f32.partialorder %v1457_v6, 0.0  ;;  %v1055_v14 = vmul.f32 0.2, %v1457_v6 }
 0x40e   :  { %v1748_v54 = vsel %vm1044_vm11, %v1454_v1, %v1052_v10  ;;  %v1750_v17 = vsel %vm1046_vm12, %v1456_v2, %v1054_v11  ;;  %v956_v18 = vpop.f32.mrb[11].mxu1  ;;  %v1038_v19 = vpop.f32.mrb[15].mxu0 }
 0x40f   :  { %v1752_v59 = vsel %vm1045_vm13, %v1455_v5, %v1053_v12  ;;  %v1754_v21 = vsel %vm1047_vm14, %v1457_v6, %v1055_v14 }
 0x410   :  { %1546 = dma.done.wait [#allocation6 + $0x3], 8192 }
 0x411   :  { %1547 = vsyncadd [#allocation6 + $0x3], 4294959104  ;;  %v1069_v22 = vpack.c.bf16 %v1057_v49, %v1057_v49  ;;  %v1071_v23 = vpack.c.bf16 %v1059_v50, %v1059_v50  ;;  %v1084_v24 = vld [vmem:[#allocation5 + $0x40] sm:$0xff]  ;;  %v1085_v28 = vld [vmem:[#allocation5 + $0x48] sm:$0xff]  ;;  %v1068_v53 = vpack.c.bf16 %v1740_v46, %v1740_v46  ;;  %v1070_v56 = vpack.c.bf16 %v1742_v36, %v1742_v36 }
 0x412   :  { %v1100_v25 = vld [vmem:[#allocation5 + $0xc0] sm:$0xff]  ;;  %1362 = vmatprep.subr.bf16.mxu1 %v1084_v24  ;;  %v1101_v29 = vld [vmem:[#allocation5 + $0xc8] sm:$0xff]  ;;  %v1086_v32 = vld [vmem:[#allocation5 + $0x50] sm:$0xff]  ;;  %v1073_v63 = vpack.c.bf16 %v1752_v59, %v1752_v59  ;;  %v1075_v0 = vpack.c.bf16 %v1754_v21, %v1754_v21 }
 0x413   :  { %1179 = vmatprep.mubr.bf16.mxu1 %v1069_v22  ;;  %1219 = vmatprep.mubr.bf16.mxu0 %v1071_v23  ;;  %v1076_v27 = vld [vmem:[#allocation5] sm:$0xff]  ;;  %v1077_v30 = vld [vmem:[#allocation5 + $0x8] sm:$0xff]  ;;  %v1102_v33 = vld [vmem:[#allocation5 + $0xd0] sm:$0xff] }
 0x414   :  { %1384 = vmatprep.subr.bf16.mxu0 %v1100_v25  ;;  %v1092_v55 = vld [vmem:[#allocation5 + $0x80] sm:$0xff]  ;;  %1363 = vmatpush3.bf16.msra.mxu1 %v1076_v27  ;;  %v1093_v31 = vld [vmem:[#allocation5 + $0x88] sm:$0xff]  ;;  %v1078_v35 = vld [vmem:[#allocation5 + $0x10] sm:$0xff] }
 0x415   :  { %1385 = vmatpush3.bf16.msra.mxu0 %v1092_v55  ;;  %1364 = vmatprep.subr.bf16.mxu1 %v1085_v28  ;;  %v1094_v37 = vld [vmem:[#allocation5 + $0x90] sm:$0xff]  ;;  %v1087_v38 = vld [vmem:[#allocation5 + $0x58] sm:$0xff]  ;;  %v1088_v8 = vld [vmem:[#allocation5 + $0x60] sm:$0xff] }
 0x416   :  { %1386 = vmatprep.subr.bf16.mxu0 %v1101_v29  ;;  %v1103_v60 = vld [vmem:[#allocation5 + $0xd8] sm:$0xff]  ;;  %v1104_v40 = vld [vmem:[#allocation5 + $0xe0] sm:$0xff]  ;;  %v1089_v42 = vld [vmem:[#allocation5 + $0x68] sm:$0xff] }
 0x417   :  { %v1079_v39 = vld [vmem:[#allocation5 + $0x18] sm:$0xff]  ;;  %v1080_v41 = vld [vmem:[#allocation5 + $0x20] sm:$0xff]  ;;  %v1105_v43 = vld [vmem:[#allocation5 + $0xe8] sm:$0xff] }
 0x418   :  { %1365 = vmatpush3.bf16.msra.mxu1 %v1077_v30  ;;  %v1095_v26 = vld [vmem:[#allocation5 + $0x98] sm:$0xff]  ;;  %v1096_v20 = vld [vmem:[#allocation5 + $0xa0] sm:$0xff]  ;;  %v1081_v16 = vld [vmem:[#allocation5 + $0x28] sm:$0xff]  ;;  %v1072_v30 = vpack.c.bf16 %v1748_v54, %v1748_v54 }
 0x419   :  { %1387 = vmatpush3.bf16.msra.mxu0 %v1093_v31  ;;  %1366 = vmatprep.subr.bf16.mxu1 %v1086_v32  ;;  %v1097_v44 = vld [vmem:[#allocation5 + $0xa8] sm:$0xff]  ;;  %v1090_v13 = vld [vmem:[#allocation5 + $0x70] sm:$0xff]  ;;  %v1091_v47 = vld [vmem:[#allocation5 + $0x78] sm:$0xff]  ;;  %v1074_v31 = vpack.c.bf16 %v1750_v17, %v1750_v17 }
 0x41a   :  { %1388 = vmatprep.subr.bf16.mxu0 %v1102_v33  ;;  %v1106_v45 = vld [vmem:[#allocation5 + $0xf0] sm:$0xff]  ;;  %v1107_v48 = vld [vmem:[#allocation5 + $0xf8] sm:$0xff]  ;;  %v1116_v51 = vld [vmem:[#allocation5 + $0x140] sm:$0xff] }
 0x41b   :  { %v1082_v34 = vld [vmem:[#allocation5 + $0x30] sm:$0xff]  ;;  %v1083_v49 = vld [vmem:[#allocation5 + $0x38] sm:$0xff]  ;;  %v1132_v52 = vld [vmem:[#allocation5 + $0x1c0] sm:$0xff] }
 0x41c   :  { %1367 = vmatpush3.bf16.msra.mxu1 %v1078_v35  ;;  %v1098_v15 = vld [vmem:[#allocation5 + $0xb0] sm:$0xff]  ;;  %v1099_v50 = vld [vmem:[#allocation5 + $0xb8] sm:$0xff]  ;;  %v1108_v57 = vld [vmem:[#allocation5 + $0x100] sm:$0xff] }
 0x41d   :  { %1389 = vmatpush3.bf16.msra.mxu0 %v1094_v37  ;;  %1368 = vmatprep.subr.bf16.mxu1 %v1087_v38  ;;  %v1124_v58 = vld [vmem:[#allocation5 + $0x180] sm:$0xff]  ;;  %v1117_v61 = vld [vmem:[#allocation5 + $0x148] sm:$0xff]  ;;  %v1118_v1 = vld [vmem:[#allocation5 + $0x150] sm:$0xff] }
 0x41e   :  { %1390 = vmatprep.subr.bf16.mxu0 %v1103_v60  ;;  %v1133_v62 = vld [vmem:[#allocation5 + $0x1c8] sm:$0xff]  ;;  %v1134_v2 = vld [vmem:[#allocation5 + $0x1d0] sm:$0xff]  ;;  %v1119_v5 = vld [vmem:[#allocation5 + $0x158] sm:$0xff] }
 0x41f   :  { %v1109_v46 = vld [vmem:[#allocation5 + $0x108] sm:$0xff]  ;;  %v1110_v3 = vld [vmem:[#allocation5 + $0x110] sm:$0xff]  ;;  %v1135_v6 = vld [vmem:[#allocation5 + $0x1d8] sm:$0xff] }
 0x420   :  { %1369 = vmatpush3.bf16.msra.mxu1 %v1079_v39  ;;  %v1125_v36 = vld [vmem:[#allocation5 + $0x188] sm:$0xff]  ;;  %v1126_v4 = vld [vmem:[#allocation5 + $0x190] sm:$0xff]  ;;  %v1111_v7 = vld [vmem:[#allocation5 + $0x118] sm:$0xff] }
 0x421   :  { %1391 = vmatpush3.bf16.msra.mxu0 %v1095_v26  ;;  %1370 = vmatprep.subr.bf16.mxu1 %v1088_v8  ;;  %v1127_v9 = vld [vmem:[#allocation5 + $0x198] sm:$0xff]  ;;  %v1120_v10 = vld [vmem:[#allocation5 + $0x160] sm:$0xff]  ;;  %v1121_v18 = vld [vmem:[#allocation5 + $0x168] sm:$0xff] }
 0x422   :  { %1392 = vmatprep.subr.bf16.mxu0 %v1104_v40  ;;  %v1136_v11 = vld [vmem:[#allocation5 + $0x1e0] sm:$0xff]  ;;  %v1137_v19 = vld [vmem:[#allocation5 + $0x1e8] sm:$0xff]  ;;  %v1122_v22 = vld [vmem:[#allocation5 + $0x170] sm:$0xff] }
 0x423   :  { %v1112_v12 = vld [vmem:[#allocation5 + $0x120] sm:$0xff]  ;;  %v1113_v59 = vld [vmem:[#allocation5 + $0x128] sm:$0xff]  ;;  %v1138_v23 = vld [vmem:[#allocation5 + $0x1f0] sm:$0xff] }
 0x424   :  { %1371 = vmatpush3.bf16.msra.mxu1 %v1080_v41  ;;  %v1128_v14 = vld [vmem:[#allocation5 + $0x1a0] sm:$0xff]  ;;  %v1129_v21 = vld [vmem:[#allocation5 + $0x1a8] sm:$0xff]  ;;  %v1114_v24 = vld [vmem:[#allocation5 + $0x130] sm:$0xff] }
 0x425   :  { %1393 = vmatpush3.bf16.msra.mxu0 %v1096_v20  ;;  %1372 = vmatprep.subr.bf16.mxu1 %v1089_v42  ;;  %v1130_v25 = vld [vmem:[#allocation5 + $0x1b0] sm:$0xff]  ;;  %v1123_v27 = vld [vmem:[#allocation5 + $0x178] sm:$0xff]  ;;  %v1357_v35 = vld [vmem:[%s1791_s8] ss:$0 sm:$0xff]  ;;  %s1569_s8 = smov [#allocation7]  }
 0x426   :  { %1394 = vmatprep.subr.bf16.mxu0 %v1105_v43  ;;  %v1139_v55 = vld [vmem:[#allocation5 + $0x1f8] sm:$0xff]  ;;  %s1315_s30 = sshll.u32 %s1569_s8, 4  ;;  %s1316_s30 = int_to_ptr.vmem [resolvable:$true] %s1315_s30 }
 0x427   :  { %v1115_v28 = vld [vmem:[#allocation5 + $0x138] sm:$0xff]  ;;  %s1518_s10 = scalar_lea.vmem %s1316_s30, 128  ;;  %p1523_p9 = scmp.lt.s32.totalorder %s1316_s30, %s1316_s30 }
 0x428   :  { %1373 = vmatpush3.bf16.msra.mxu1 %v1081_v16  ;;  %v1131_v29 = vld [vmem:[#allocation5 + $0x1b8] sm:$0xff]  ;;  %p1519_p8 = scmp.ne.s32.totalorder %s1316_s30, %s1518_s10  ;;  %p1524_p10 = scmp.lt.s32.totalorder %s1518_s10, %s1518_s10 }
 0x429   :  { %1395 = vmatpush3.bf16.msra.mxu0 %v1097_v44  ;;  %1374 = vmatprep.subr.bf16.mxu1 %v1090_v13 }
 0x42a   :  { %1396 = vmatprep.subr.bf16.mxu0 %v1106_v45  ;;  %p1525_p11 = por %p1524_p10, %p1523_p9 }
 0x42c   :  { %1375 = vmatpush3.bf16.msra.mxu1 %v1082_v34  ;;  %p1526_p12 = pnand %p1525_p11, %p1519_p8 }
 0x42d   :  { %1397 = vmatpush3.bf16.msra.mxu0 %v1098_v15  ;;  %1376 = vmatprep.subr.bf16.mxu1 %v1091_v47 }
 0x42e   :  { %1398 = vmatprep.subr.bf16.mxu0 %v1107_v48 }
 0x430   :  { %1377 = vmatpush3.bf16.msra.mxu1 %v1083_v49 }
 0x431   :  { %1399 = vmatpush3.bf16.msra.mxu0 %v1099_v50  ;;  %1406 = vmatprep.subr.bf16.mxu1 %v1116_v51 }
 0x432   :  { %1428 = vmatprep.subr.bf16.mxu0 %v1132_v52 }
 0x433   :  { %1180 = vmatmul.mubr.bf16.vlgmr.msra.gmra.mrb[12].mxu1 %v1068_v53 }
 0x434   :  { %1220 = vmatmul.mubr.bf16.vlgmr.msra.gmra.mrb[16].mxu0 %v1070_v56  ;;  %1407 = vmatpush3.bf16.msra.mxu1 %v1108_v57 }
 0x435   :  { %1429 = vmatpush3.bf16.msra.mxu0 %v1124_v58  ;;  %1408 = vmatprep.subr.bf16.mxu1 %v1117_v61 }
 0x436   :  { %1430 = vmatprep.subr.bf16.mxu0 %v1133_v62  ;;  %1259 = vmatprep.mubr.bf16.mxu1 %v1073_v63 }
 0x437   :  { %1299 = vmatprep.mubr.bf16.mxu0 %v1075_v0 }
 0x438   :  { %1409 = vmatpush3.bf16.msra.mxu1 %v1109_v46 }
 0x439   :  { %1431 = vmatpush3.bf16.msra.mxu0 %v1125_v36  ;;  %1410 = vmatprep.subr.bf16.mxu1 %v1118_v1 }
 0x43a   :  { %1432 = vmatprep.subr.bf16.mxu0 %v1134_v2 }
 0x43c   :  { %1411 = vmatpush3.bf16.msra.mxu1 %v1110_v3 }
 0x43d   :  { %1433 = vmatpush3.bf16.msra.mxu0 %v1126_v4  ;;  %1412 = vmatprep.subr.bf16.mxu1 %v1119_v5 }
 0x43e   :  { %1434 = vmatprep.subr.bf16.mxu0 %v1135_v6 }
 0x440   :  { %1413 = vmatpush3.bf16.msra.mxu1 %v1111_v7 }
 0x441   :  { %1435 = vmatpush3.bf16.msra.mxu0 %v1127_v9  ;;  %1414 = vmatprep.subr.bf16.mxu1 %v1120_v10 }
 0x442   :  { %1436 = vmatprep.subr.bf16.mxu0 %v1136_v11 }
 0x444   :  { %1415 = vmatpush3.bf16.msra.mxu1 %v1112_v12 }
 0x445   :  { %1437 = vmatpush3.bf16.msra.mxu0 %v1128_v14  ;;  %1416 = vmatprep.subr.bf16.mxu1 %v1121_v18 }
 0x446   :  { %1438 = vmatprep.subr.bf16.mxu0 %v1137_v19 }
 0x448   :  { %1417 = vmatpush3.bf16.msra.mxu1 %v1113_v59 }
 0x449   :  { %1439 = vmatpush3.bf16.msra.mxu0 %v1129_v21  ;;  %1418 = vmatprep.subr.bf16.mxu1 %v1122_v22 }
 0x44a   :  { %1440 = vmatprep.subr.bf16.mxu0 %v1138_v23 }
 0x44c   :  { %1419 = vmatpush3.bf16.msra.mxu1 %v1114_v24 }
 0x44d   :  { %1441 = vmatpush3.bf16.msra.mxu0 %v1130_v25  ;;  %1420 = vmatprep.subr.bf16.mxu1 %v1123_v27 }
 0x44e   :  { %1442 = vmatprep.subr.bf16.mxu0 %v1139_v55 }
 0x450   :  { %1421 = vmatpush3.bf16.msra.mxu1 %v1115_v28 }
 0x451   :  { %1443 = vmatpush3.bf16.msra.mxu0 %v1131_v29 }
 0x453   :  { %1260 = vmatmul.mubr.bf16.vlgmr.msra.gmra.mrb[16].mxu1 %v1072_v30 }
 0x454   :  { %1300 = vmatmul.mubr.bf16.vlgmr.msra.gmra.mrb[20].mxu0 %v1074_v31 }
 0x506   :  { %v1378_v32 = vpop.f32.mrb[12].mxu1 }
 0x507   :  { %v1400_v33 = vpop.f32.mrb[16].mxu0  ;;  %v1379_v37 = vpop.f32.mrb[13].mxu1 }
 0x508   :  { %v1401_v38 = vpop.f32.mrb[17].mxu0  ;;  %v1380_v60 = vadd.f32 %v1379_v37, %v1378_v32  ;;  %v1381_v26 = vpop.f32.mrb[14].mxu1 }
 0x509   :  { %v1402_v39 = vadd.f32 %v1401_v38, %v1400_v33  ;;  %v1403_v8 = vpop.f32.mrb[18].mxu0  ;;  %v1382_v54 = vpop.f32.mrb[15].mxu1 }
 0x50a   :  { %v1404_v40 = vpop.f32.mrb[19].mxu0  ;;  %v1182_v41 = vadd.f32 %v1380_v60, %v1357_v35 }
 0x50c   :  { %v1222_v17 = vadd.f32 %v1402_v39, %v1182_v41 }
 0x526   :  { %v1422_v20 = vpop.f32.mrb[16].mxu1 }
 0x527   :  { %v1444_v42 = vpop.f32.mrb[20].mxu0  ;;  %v1423_v43 = vpop.f32.mrb[17].mxu1 }
 0x528   :  { %v1445_v16 = vpop.f32.mrb[21].mxu0  ;;  %v1424_v44 = vadd.f32 %v1423_v43, %v1422_v20  ;;  %v1425_v45 = vpop.f32.mrb[18].mxu1 }
 0x529   :  { %v1446_v13 = vadd.f32 %v1445_v16, %v1444_v42  ;;  %v1447_v34 = vpop.f32.mrb[22].mxu0  ;;  %v1426_v15 = vpop.f32.mrb[19].mxu1 }
 0x52a   :  { %v1448_v47 = vpop.f32.mrb[23].mxu0  ;;  %v1262_v48 = vadd.f32 %v1424_v44, %v1222_v17 }
 0x52c   :  { %v1302_v49 = vadd.f32 %v1446_v13, %v1262_v48 }
 0x52e   :  { %1494 = vtanh.f32 %v1302_v49 }
 0x538   :  { %v1495_v50 = vpop.eup %1494 }
 0x539   :  { %1308 = vst [vmem:[#allocation7] sm:$0xff] %v1495_v50 }
 0x53a   :  { %1529 = shalt.err (!%p1526_p12)
}
 0x53b   :  { %s1530_s15 = scalar_lea.hbm %s1792_s9, 128 }
 0x53c   :  { %p1531_p13 = scmp.ne.s32.totalorder %s1792_s9, %s1530_s15  ;;  %p1534_p0 = scmp.lt.u32.totalorder %s1530_s15, %s1792_s9 }
 0x53e   :  { %p1536_p1 = pnand %p1534_p0, %p1531_p13 }
 0x540   :  { %1539 = shalt.err (!%p1536_p1)
}
 0x541   :  { %1318 = dma.vmem_to_hbm [thread:$0]  %s1316_s30, 128, %s1792_s9, [#allocation8]  }
 0x542   :  { %1548 = dma.done.wait [#allocation8], 128  }
 0x543   :  { %1549 = vsyncadd [#allocation8], 4294967168 }
 0x544   :  { %1322 = vsyncpa [#allocation8], 1 }
 0x545   :  { %1323 = vsyncmov [#allocation6] }
 0x548   :  { %s1324_s16 = vpop.sfrf %1323 }
 0x549   :  { %p1358_p2 = scmp.ne.s32.totalorder %s1324_s16, 0 }
 0x54b   :  { %1328 = shalt.err (%p1358_p2)  }
 0x54c   :  { %1330 = vsyncmov [#allocation6 + $0x1] }
 0x54f   :  { %s1331_s25 = vpop.sfrf %1330 }
 0x550   :  { %p1359_p3 = scmp.ne.s32.totalorder %s1331_s25, 0 }
 0x552   :  { %1335 = shalt.err (%p1359_p3)  }
 0x553   :  { %1337 = vsyncmov [#allocation6 + $0x2] }
 0x556   :  { %s1338_s13 = vpop.sfrf %1337 }
 0x557   :  { %p1360_p4 = scmp.ne.s32.totalorder %s1338_s13, 0 }
 0x559   :  { %1342 = shalt.err (%p1360_p4)  }
 0x55a   :  { %1344 = vsyncmov [#allocation6 + $0x3] }
 0x55d   :  { %s1345_s23 = vpop.sfrf %1344 }
 0x55e   :  { %p1361_p5 = scmp.ne.s32.totalorder %s1345_s23, 0 }
 0x560   :  { %1349 = shalt.err (%p1361_p5)  }

</bundles_post_ra>
